<compile_context>
chip_gen: v7x
topology: tpu7x:2x2x1
jax: 0.10.0
libtpu: 0.0.40
codegen_flags: <defaults>
</compile_context>

<pallas_src>
import functools

import jax
import jax.numpy as jnp
from jax import lax
from jax.experimental import pallas as pl
from jax.experimental.pallas import tpu as pltpu


LANE = 128  # TPU lane width: channel dims are zero-padded to 128.


def _round_up(x, m):
    return ((x + m - 1) // m) * m


def _vmem_capacity():
    """Per-core VMEM bytes for this generation (conservative fallback: 64 MiB)."""
    try:
        return int(pltpu.get_tpu_info().vmem_capacity_bytes)
    except Exception:
        return 64 * 1024 * 1024


def _choose_tiles(num_nodes):
    """Pick (row_tile, padded_node_count).

    The dominant VMEM consumer is the A row tile: int8 double-buffered plus the
    in-kernel int8 -> f32 -> bf16 up-conversion temporaries (~8 bytes / element
    worst case).  Budget ~45% of this generation's VMEM for it, pick the largest
    tile that fits, then pad the node count up to a multiple of the tile
    (padding cost is O(R * n_pad * tm) A bytes, negligible vs R * n_pad^2).
    Prefer >= 2 row tiles so the "parallel" row axis can split across the two
    TensorCores on v7x.
    """
    cap = _vmem_capacity()
    budget = int(cap * 0.45)
    n_min = _round_up(max(num_nodes, LANE), LANE)
    best = None
    for tm in (1024, 512, 256, 128):
        if tm > n_min:              # don't inflate a tiny graph up to a huge tile
            continue
        n_pad = _round_up(n_min, tm)
        if 8 * tm * n_pad <= budget:
            if best is None:
                best = (tm, n_pad)
            if n_pad // tm >= 2:    # keep the megacore split alive
                return tm, n_pad
    if best is not None:
        return best
    return 128, _round_up(n_min, 128)


# ----------------------------- Pallas kernel --------------------------------

def _make_rgcn_layer_kernel(tm, activation, valid_cols):
    """activation in {'relu', 'log_softmax', None}, applied on the last relation step."""

    def kernel(a_ref, inv_ref, x_ref, w_ref, root_ref, bias_ref, o_ref, acc_ref):
        m = pl.program_id(0)   # node-row tile (parallel axis)
        r = pl.program_id(1)   # relation      (reduction axis, innermost)

        # Initialize the f32 accumulator with the self-loop term + bias.
        @pl.when(r == 0)
        def _init():
            row0 = pl.multiple_of(m * tm, tm)
            x_tile = x_ref[pl.ds(row0, tm), :]
            acc_ref[...] = (
                jnp.dot(x_tile, root_ref[...], preferred_element_type=jnp.float32)
                + bias_ref[...]
            )

        # Relation r message passing on exact integer counts:
        #   contrib = (C_r[row tile] @ X) @ W_r   (bf16 MXU, f32 accumulation)
        #   then an exact f32 per-row 1/deg rescale on the VPU.
        a = a_ref[0].astype(jnp.float32).astype(jnp.bfloat16)
        msg = jnp.dot(a, x_ref[...], preferred_element_type=jnp.float32)
        contrib = jnp.dot(msg.astype(x_ref.dtype), w_ref[0],
                          preferred_element_type=jnp.float32)
        acc_ref[...] += inv_ref[0] * contrib

        # Fused epilogue on the last relation step.
        @pl.when(r == pl.num_programs(1) - 1)
        def _fin():
            acc = acc_ref[...]
            if activation == "relu":
                o_ref[...] = jnp.maximum(acc, 0.0).astype(o_ref.dtype)
            elif activation == "log_softmax":
                # Padded lanes must not participate in the reduction.
                lane = lax.broadcasted_iota(jnp.int32, acc.shape, 1)
                acc = jnp.where(lane < valid_cols, acc, jnp.float32(-1e30))
                mx = jnp.max(acc, axis=1, keepdims=True)
                z = acc - mx
                lse = jnp.log(jnp.sum(jnp.exp(z), axis=1, keepdims=True))
                o_ref[...] = (z - lse).astype(o_ref.dtype)
            else:
                o_ref[...] = acc.astype(o_ref.dtype)

    return kernel


def rgcn_layer(A_counts, inv_deg, x, weight, root, bias, *,
               activation, valid_cols, out_dtype, tm):
    """One FastRGCNConv layer (+ fused activation) on TPU via Pallas.

    A_counts: (R, Np, Np)   int8  raw relational edge counts (node-padded)
    inv_deg:  (R, Np, 1)    f32   1/max(in-degree, 1) per (relation, node)
    x:        (Np, Cin)     bf16
    weight:   (R, Cin, Cp)  bf16  basis-combined relation weights (Cp lane-padded)
    root:     (Cin, Cp)     bf16
    bias:     (1, Cp)       f32
    returns   (Np, Cp)      out_dtype
    """
    R, n_pad, _ = A_counts.shape
    cin = x.shape[1]
    cpad = root.shape[1]
    grid = (n_pad // tm, R)
    out_bytes = jnp.dtype(out_dtype).itemsize

    kernel = _make_rgcn_layer_kernel(tm, activation, valid_cols)

    # VMEM footprint estimate (A double-buffered + conversion temps dominate;
    # constant-index blocks counted once).
    est = (2 * tm * n_pad * 1                # A int8 tiles, double-buffered
           + tm * n_pad * (4 + 2)            # int8 -> f32 -> bf16 conversion temps
           + 2 * n_pad * cin * 2             # X (constant block index)
           + 2 * cin * cpad * 2              # W_r tiles
           + 2 * cin * cpad * 2 + 2 * cpad * 4   # root + bias
           + 2 * tm * 4                      # inv_deg tiles
           + 2 * tm * cpad * out_bytes       # output tiles
           + tm * cpad * 4                   # f32 scratch accumulator
           + 2 * tm * max(cin, cpad) * 4)    # matmul temporaries / slack
    cap = _vmem_capacity()
    vmem_limit = int(min(max(int(1.3 * est), 32 * 1024 * 1024), int(cap * 0.9)))

    flops = (2 * R * n_pad * n_pad * cin          # C_r @ X
             + 2 * R * n_pad * cin * cpad         # msg @ W_r
             + 2 * n_pad * cin * cpad)            # X @ root
    bytes_accessed = int(A_counts.size * 1 + inv_deg.size * 4 + x.size * 2
                         + weight.size * 2 + root.size * 2 + bias.size * 4
                         + n_pad * cpad * out_bytes)
    transcendentals = n_pad * cpad if activation == "log_softmax" else 0

    return pl.pallas_call(
        kernel,
        out_shape=jax.ShapeDtypeStruct((n_pad, cpad), out_dtype),
        grid_spec=pltpu.PrefetchScalarGridSpec(
            num_scalar_prefetch=0,
            grid=grid,
            in_specs=[
                pl.BlockSpec((1, tm, n_pad), lambda m, r: (r, m, 0)),   # A counts
                pl.BlockSpec((1, tm, 1), lambda m, r: (r, m, 0)),       # 1/deg
                pl.BlockSpec((n_pad, cin), lambda m, r: (0, 0)),        # X (full, resident)
                pl.BlockSpec((1, cin, cpad), lambda m, r: (r, 0, 0)),   # W_r
                pl.BlockSpec((cin, cpad), lambda m, r: (0, 0)),         # root
                pl.BlockSpec((1, cpad), lambda m, r: (0, 0)),           # bias
            ],
            out_specs=pl.BlockSpec((tm, cpad), lambda m, r: (m, 0)),
            scratch_shapes=[pltpu.VMEM((tm, cpad), jnp.float32)],
        ),
        compiler_params=pltpu.CompilerParams(
            dimension_semantics=("parallel", "arbitrary"),
            vmem_limit_bytes=vmem_limit,
        ),
        cost_estimate=pl.CostEstimate(
            flops=int(flops),
            transcendentals=int(transcendentals),
            bytes_accessed=bytes_accessed,
        ),
    )(A_counts, inv_deg, x, weight, root, bias)


# ------------------------------- JAX glue -----------------------------------

def build_count_adj(edge_index, edge_type, num_relations, n_pad):
    """Dense padded relational edge-count matrix (int8) + per-(relation, node)
    inverse in-degree (f32).

    C[r, i, j] = #(edges j->i of type r);  inv_deg[r, i] = 1/max(sum_j C[r,i,j], 1).
    The 1/deg 'mean' normalisation of FastRGCNConv.aggregate() is applied inside
    the kernel as an exact f32 per-row rescale, so A's HBM stream is one byte
    per entry and the counts stay exact.
    """
    src = edge_index[0].astype(jnp.int32)
    dst = edge_index[1].astype(jnp.int32)
    et = edge_type.astype(jnp.int32)

    counts = jnp.zeros((num_relations, n_pad, n_pad), jnp.int32)
    counts = counts.at[et, dst, src].add(1)
    # TODO(synk): int8 wraps past 127 parallel same-type edges between one node
    # pair; switch to int16/bf16 counts for multigraphs denser than that.
    counts = counts.astype(jnp.int8)

    # Per-(relation, destination) in-degree via an edge-list segment sum
    # (no dense (R, N, N) reduction pass).
    flat = et * n_pad + dst
    deg = jnp.zeros((num_relations * n_pad,), jnp.float32).at[flat].add(1.0)
    inv_deg = (1.0 / jnp.maximum(deg, 1.0)).reshape(num_relations, n_pad, 1)
    return counts, inv_deg


def combine_basis(comp, basis, rows_pad, cols_pad):
    """W_r = sum_b comp[r, b] * basis[b], zero-padded to (R, rows_pad, cols_pad), bf16."""
    R, B = comp.shape
    _, cin, cout = basis.shape
    w = (comp @ basis.reshape(B, cin * cout)).reshape(R, cin, cout)
    w = jnp.pad(w, ((0, 0), (0, rows_pad - cin), (0, cols_pad - cout)))
    return w.astype(jnp.bfloat16)


def pad2(m, rows_pad, cols_pad):
    r, c = m.shape
    return jnp.pad(m, ((0, rows_pad - r), (0, cols_pad - c)))


def init_params(key, in_channels, hidden, num_classes, num_relations, num_bases):
    ks = jax.random.split(key, 8)

    def glorot(k, shape):
        fan_in, fan_out = shape[-2], shape[-1]
        lim = jnp.sqrt(6.0 / (fan_in + fan_out))
        return jax.random.uniform(k, shape, jnp.float32, -lim, lim)

    return {
        "basis1": glorot(ks[0], (num_bases, in_channels, hidden)),
        "comp1": glorot(ks[1], (num_relations, num_bases)),
        "root1": glorot(ks[2], (in_channels, hidden)),
        "bias1": jnp.zeros((1, hidden), jnp.float32),
        "basis2": glorot(ks[3], (num_bases, hidden, num_classes)),
        "comp2": glorot(ks[4], (num_relations, num_bases)),
        "root2": glorot(ks[5], (hidden, num_classes)),
        "bias2": jnp.zeros((1, num_classes), jnp.float32),
    }


@functools.partial(jax.jit,
                   static_argnames=("num_nodes", "num_relations", "num_classes"))
def fast_rgcn_forward(params, x, edge_index, edge_type,
                      num_nodes, num_relations, num_classes):
    in_channels = x.shape[1]
    hidden = params["root1"].shape[1]
    tm, n_pad = _choose_tiles(num_nodes)
    hpad = _round_up(hidden, LANE)
    cpad = _round_up(num_classes, LANE)

    # TODO(synk): for very large sparse graphs replace the dense (R, N, N) count
    # matrix with a scalar-prefetch CSR/edge-gather kernel; the dense path moves
    # O(R * N^2) bytes.
    A_counts, inv_deg = build_count_adj(edge_index, edge_type, num_relations, n_pad)

    xp = jnp.zeros((n_pad, in_channels), jnp.float32).at[:num_nodes].set(x)
    xp = xp.astype(jnp.bfloat16)

    # Layer 1: in_channels -> hidden (padded to 128 lanes), fused relu, bf16 out.
    w1 = combine_basis(params["comp1"], params["basis1"], in_channels, hpad)
    root1 = pad2(params["root1"], in_channels, hpad).astype(jnp.bfloat16)
    bias1 = pad2(params["bias1"], 1, hpad)
    h = rgcn_layer(A_counts, inv_deg, xp, w1, root1, bias1,
                   activation="relu", valid_cols=hidden,
                   out_dtype=jnp.bfloat16, tm=tm)

    # Layer 2: hidden -> num_classes (padded to 128 lanes), fused log_softmax.
    w2 = combine_basis(params["comp2"], params["basis2"], hpad, cpad)
    root2 = pad2(params["root2"], hpad, cpad).astype(jnp.bfloat16)
    bias2 = pad2(params["bias2"], 1, cpad)
    out = rgcn_layer(A_counts, inv_deg, h, w2, root2, bias2,
                     activation="log_softmax", valid_cols=num_classes,
                     out_dtype=jnp.float32, tm=tm)

    return out[:num_nodes, :num_classes]


def reference_forward(params, x, edge_index, edge_type,
                      num_nodes, num_relations, num_classes):
    """Pure-JAX f32 reference reproducing PyG FastRGCNConv (aggr='mean')."""
    src, dst = edge_index[0], edge_index[1]

    def layer(h, comp, basis, root, bias):
        R, B = comp.shape
        _, cin, cout = basis.shape
        W = (comp @ basis.reshape(B, -1)).reshape(R, cin, cout)
        A = jnp.zeros((R, num_nodes, num_nodes), jnp.float32)
        A = A.at[edge_type, dst, src].add(1.0)
        deg = jnp.clip(jnp.sum(A, axis=2, keepdims=True), 1.0, None)
        A = A / deg
        out = h @ root + bias
        for r in range(num_relations):
            out = out + A[r] @ (h @ W[r])
        return out

    h = jnp.maximum(layer(x, params["comp1"], params["basis1"],
                          params["root1"], params["bias1"]), 0.0)
    logits = layer(h, params["comp2"], params["basis2"],
                   params["root2"], params["bias2"])
    return jax.nn.log_softmax(logits, axis=1)


# --------------------------------- main --------------------------------------

if __name__ == "__main__":
    num_nodes = 32
    in_channels = 8
    hidden = 16
    num_classes = 4
    num_relations = 3
    num_bases = 30
    num_edges = 64

    key = jax.random.PRNGKey(0)
    k_x, k_src, k_dst, k_et, k_params = jax.random.split(key, 5)

    x = jax.random.normal(k_x, (num_nodes, in_channels), jnp.float32)
    src = jax.random.randint(k_src, (num_edges,), 0, num_nodes, jnp.int32)
    dst = jax.random.randint(k_dst, (num_edges,), 0, num_nodes, jnp.int32)
    edge_index = jnp.stack([src, dst], axis=0)                    # (2, E)
    edge_type = jax.random.randint(k_et, (num_edges,), 0, num_relations, jnp.int32)

    params = init_params(k_params, in_channels, hidden, num_classes,
                         num_relations, num_bases)

    out = fast_rgcn_forward(params, x, edge_index, edge_type,
                            num_nodes, num_relations, num_classes)
    out = jax.block_until_ready(out)

    assert out.shape == (num_nodes, num_classes)
    # log_softmax rows should sum (in prob space) to ~1
    assert jnp.allclose(jnp.sum(jnp.exp(out), axis=1), 1.0, atol=1e-3)

    # Compare against a pure-JAX f32 reference (bf16 operands -> loose tolerance).
    ref = reference_forward(params, x, edge_index, edge_type,
                            num_nodes, num_relations, num_classes)
    max_err = float(jnp.max(jnp.abs(out - ref)))
    assert max_err < 0.15, f"max |pallas - ref| = {max_err}"

    print("KERNEL_OK")
</pallas_src>

<mosaic_0001>
module attributes {stable_mosaic.version = 11 : i64} {
  func.func private @main(%arg0: i32) attributes {dimension_semantics = [#tpu.dimension_semantics<core_parallel>], iteration_bounds = array<i64: 2>, tpu.core_type = #tpu.core_type<sc_scalar_subcore>, window_params = []} {
    return
  }
}

module attributes {stable_mosaic.version = 11 : i64} {
  func.func private @main(%arg0: i32) attributes {dimension_semantics = [#tpu.dimension_semantics<core_parallel>], iteration_bounds = array<i64: 2>, tpu.core_type = #tpu.core_type<sc_scalar_subcore>, window_params = []} {
    return
  }
}

module attributes {stable_mosaic.version = 11 : i64} {
  func.func @kernel(%arg0: i32, %arg1: i32, %arg2: memref<1x128x128xi8, #tpu.memory_space<vmem>>, %arg3: memref<1x128x1xf32, #tpu.memory_space<vmem>>, %arg4: memref<128x8xbf16, #tpu.memory_space<vmem>>, %arg5: memref<1x8x128xbf16, #tpu.memory_space<vmem>>, %arg6: memref<8x128xbf16, #tpu.memory_space<vmem>>, %arg7: memref<1x128xf32, #tpu.memory_space<vmem>>, %arg8: memref<128x128xbf16, #tpu.memory_space<vmem>>, %arg9: memref<128x128xf32, #tpu.memory_space<vmem>>) attributes {dimension_semantics = [#tpu.dimension_semantics<parallel>, #tpu.dimension_semantics<arbitrary>], iteration_bounds = array<i64: 1, 3>, scalar_prefetch = 0 : i64, scratch_operands = 1 : i64, tpu.core_type = #tpu.core_type<tc>, window_params = [{transform_indices = @transform_0, window_bounds = array<i64: 1, 128, 128>}, {transform_indices = @transform_1, window_bounds = array<i64: 1, 128, 1>}, {pipeline_mode = #tpu.pipeline_mode<synchronous>, transform_indices = @transform_2, window_bounds = array<i64: 128, 8>}, {transform_indices = @transform_3, window_bounds = array<i64: 1, 8, 128>}, {pipeline_mode = #tpu.pipeline_mode<synchronous>, transform_indices = @transform_4, window_bounds = array<i64: 8, 128>}, {pipeline_mode = #tpu.pipeline_mode<synchronous>, transform_indices = @transform_5, window_bounds = array<i64: 1, 128>}, {transform_indices = @transform_6, window_bounds = array<i64: 128, 128>}]} {
    %c0_i32 = arith.constant 0 : i32
    %0 = arith.cmpi eq, %arg1, %c0_i32 : i32
    %1 = arith.extui %0 : i1 to i32
    %c0_i32_0 = arith.constant 0 : i32
    %2 = arith.cmpi ne, %1, %c0_i32_0 : i32
    scf.if %2 {
      %c128_i32 = arith.constant 128 : i32
      %23 = arith.muli %arg0, %c128_i32 : i32
      %24 = tpu.assume_multiple %23, 128 : i32
      %25 = arith.index_cast %24 : i32 to index
      %c0_17 = arith.constant 0 : index
      %26 = vector.load %arg4[%25, %c0_17] : memref<128x8xbf16, #tpu.memory_space<vmem>>, vector<128x8xbf16>
      %c0_18 = arith.constant 0 : index
      %c0_19 = arith.constant 0 : index
      %27 = vector.load %arg6[%c0_18, %c0_19] : memref<8x128xbf16, #tpu.memory_space<vmem>>, vector<8x128xbf16>
      %cst_20 = arith.constant dense<0.000000e+00> : vector<128x128xf32>
      %28 = tpu.matmul %26, %27, %cst_20 {dimension_numbers = #tpu.dot_dimension_numbers<[1], [0], [0], [1], [0, 0, 1, 1], [], []>} : vector<128x8xbf16>, vector<8x128xbf16>, vector<128x128xf32> -> vector<128x128xf32>
      %c0_21 = arith.constant 0 : index
      %c0_22 = arith.constant 0 : index
      %29 = vector.load %arg7[%c0_21, %c0_22] : memref<1x128xf32, #tpu.memory_space<vmem>>, vector<1x128xf32>
      %30 = vector.broadcast %29 : vector<1x128xf32> to vector<128x128xf32>
      %31 = arith.addf %28, %30 : vector<128x128xf32>
      %c0_23 = arith.constant 0 : index
      %c0_24 = arith.constant 0 : index
      %32 = vector.load %arg9[%c0_23, %c0_24] : memref<128x128xf32, #tpu.memory_space<vmem>>, vector<128x128xf32>
      tpu.vector_store %arg9[%c0_23, %c0_24], %31 {strides = array<i32>} : memref<128x128xf32, #tpu.memory_space<vmem>>, vector<128x128xf32>,
    } else {
    }
    %c0 = arith.constant 0 : index
    %c0_1 = arith.constant 0 : index
    %c0_2 = arith.constant 0 : index
    %3 = vector.load %arg2[%c0, %c0_1, %c0_2] : memref<1x128x128xi8, #tpu.memory_space<vmem>>, vector<1x128x128xi8>
    %4 = vector.shape_cast %3 : vector<1x128x128xi8> to vector<128x128xi8>
    %5 = arith.sitofp %4 : vector<128x128xi8> to vector<128x128xf32>
    %6 = arith.truncf %5 : vector<128x128xf32> to vector<128x128xbf16>
    %c0_3 = arith.constant 0 : index
    %c0_4 = arith.constant 0 : index
    %7 = vector.load %arg4[%c0_3, %c0_4] : memref<128x8xbf16, #tpu.memory_space<vmem>>, vector<128x8xbf16>
    %cst = arith.constant dense<0.000000e+00> : vector<128x8xf32>
    %8 = tpu.matmul %6, %7, %cst {dimension_numbers = #tpu.dot_dimension_numbers<[1], [0], [0], [1], [0, 0, 1, 1], [], []>} : vector<128x128xbf16>, vector<128x8xbf16>, vector<128x8xf32> -> vector<128x8xf32>
    %9 = arith.truncf %8 : vector<128x8xf32> to vector<128x8xbf16>
    %c0_5 = arith.constant 0 : index
    %c0_6 = arith.constant 0 : index
    %c0_7 = arith.constant 0 : index
    %10 = vector.load %arg5[%c0_5, %c0_6, %c0_7] : memref<1x8x128xbf16, #tpu.memory_space<vmem>>, vector<1x8x128xbf16>
    %11 = vector.shape_cast %10 : vector<1x8x128xbf16> to vector<8x128xbf16>
    %cst_8 = arith.constant dense<0.000000e+00> : vector<128x128xf32>
    %12 = tpu.matmul %9, %11, %cst_8 {dimension_numbers = #tpu.dot_dimension_numbers<[1], [0], [0], [1], [0, 0, 1, 1], [], []>} : vector<128x8xbf16>, vector<8x128xbf16>, vector<128x128xf32> -> vector<128x128xf32>
    %c0_9 = arith.constant 0 : index
    %c0_10 = arith.constant 0 : index
    %13 = vector.load %arg9[%c0_9, %c0_10] : memref<128x128xf32, #tpu.memory_space<vmem>>, vector<128x128xf32>
    %c0_11 = arith.constant 0 : index
    %c0_12 = arith.constant 0 : index
    %c0_13 = arith.constant 0 : index
    %14 = vector.load %arg3[%c0_11, %c0_12, %c0_13] : memref<1x128x1xf32, #tpu.memory_space<vmem>>, vector<1x128x1xf32>
    %15 = vector.shape_cast %14 : vector<1x128x1xf32> to vector<128x1xf32>
    %16 = vector.broadcast %15 : vector<128x1xf32> to vector<128x128xf32>
    %17 = arith.mulf %16, %12 : vector<128x128xf32>
    %18 = arith.addf %13, %17 : vector<128x128xf32>
    %c0_14 = arith.constant 0 : index
    %c0_15 = arith.constant 0 : index
    %19 = vector.load %arg9[%c0_14, %c0_15] : memref<128x128xf32, #tpu.memory_space<vmem>>, vector<128x128xf32>
    tpu.vector_store %arg9[%c0_14, %c0_15], %18 {strides = array<i32>} : memref<128x128xf32, #tpu.memory_space<vmem>>, vector<128x128xf32>,
    %c2_i32 = arith.constant 2 : i32
    %20 = arith.cmpi eq, %arg1, %c2_i32 : i32
    %21 = arith.extui %20 : i1 to i32
    %c0_i32_16 = arith.constant 0 : i32
    %22 = arith.cmpi ne, %21, %c0_i32_16 : i32
    scf.if %22 {
      %c0_17 = arith.constant 0 : index
      %c0_18 = arith.constant 0 : index
      %23 = vector.load %arg9[%c0_17, %c0_18] : memref<128x128xf32, #tpu.memory_space<vmem>>, vector<128x128xf32>
      %cst_19 = arith.constant 0.000000e+00 : f32
      %24 = vector.broadcast %cst_19 : f32 to vector<128x128xf32>
      %25 = arith.maximumf %23, %24 : vector<128x128xf32>
      %26 = arith.truncf %25 : vector<128x128xf32> to vector<128x128xbf16>
      %c0_20 = arith.constant 0 : index
      %c0_21 = arith.constant 0 : index
      %27 = vector.load %arg8[%c0_20, %c0_21] : memref<128x128xbf16, #tpu.memory_space<vmem>>, vector<128x128xbf16>
      tpu.vector_store %arg8[%c0_20, %c0_21], %26 {strides = array<i32>} : memref<128x128xbf16, #tpu.memory_space<vmem>>, vector<128x128xbf16>,
    } else {
    }
    return
  }
  func.func @transform_0(%arg0: i32, %arg1: i32) -> (i32, i32, i32) {
    %c0_i32 = arith.constant 0 : i32
    %c0_i32_0 = arith.constant 0 : i32
    return %arg1, %arg0, %c0_i32 : i32, i32, i32
  }
  func.func @transform_1(%arg0: i32, %arg1: i32) -> (i32, i32, i32) {
    %c0_i32 = arith.constant 0 : i32
    %c0_i32_0 = arith.constant 0 : i32
    return %arg1, %arg0, %c0_i32 : i32, i32, i32
  }
  func.func @transform_2(%arg0: i32, %arg1: i32) -> (i32, i32) {
    %c0_i32 = arith.constant 0 : i32
    %c0_i32_0 = arith.constant 0 : i32
    %c0_i32_1 = arith.constant 0 : i32
    return %c0_i32, %c0_i32_0 : i32, i32
  }
  func.func @transform_3(%arg0: i32, %arg1: i32) -> (i32, i32, i32) {
    %c0_i32 = arith.constant 0 : i32
    %c0_i32_0 = arith.constant 0 : i32
    %c0_i32_1 = arith.constant 0 : i32
    return %arg1, %c0_i32, %c0_i32_0 : i32, i32, i32
  }
  func.func @transform_4(%arg0: i32, %arg1: i32) -> (i32, i32) {
    %c0_i32 = arith.constant 0 : i32
    %c0_i32_0 = arith.constant 0 : i32
    %c0_i32_1 = arith.constant 0 : i32
    return %c0_i32, %c0_i32_0 : i32, i32
  }
  func.func @transform_5(%arg0: i32, %arg1: i32) -> (i32, i32) {
    %c0_i32 = arith.constant 0 : i32
    %c0_i32_0 = arith.constant 0 : i32
    %c0_i32_1 = arith.constant 0 : i32
    return %c0_i32, %c0_i32_0 : i32, i32
  }
  func.func @transform_6(%arg0: i32, %arg1: i32) -> (i32, i32) {
    %c0_i32 = arith.constant 0 : i32
    %c0_i32_0 = arith.constant 0 : i32
    return %arg0, %c0_i32 : i32, i32
  }
}

module attributes {stable_mosaic.version = 11 : i64} {
  func.func @kernel(%arg0: i32, %arg1: i32, %arg2: memref<1x128x128xi8, #tpu.memory_space<vmem>>, %arg3: memref<1x128x1xf32, #tpu.memory_space<vmem>>, %arg4: memref<128x128xbf16, #tpu.memory_space<vmem>>, %arg5: memref<1x128x128xbf16, #tpu.memory_space<vmem>>, %arg6: memref<128x128xbf16, #tpu.memory_space<vmem>>, %arg7: memref<1x128xf32, #tpu.memory_space<vmem>>, %arg8: memref<128x128xf32, #tpu.memory_space<vmem>>, %arg9: memref<128x128xf32, #tpu.memory_space<vmem>>) attributes {dimension_semantics = [#tpu.dimension_semantics<parallel>, #tpu.dimension_semantics<arbitrary>], iteration_bounds = array<i64: 1, 3>, scalar_prefetch = 0 : i64, scratch_operands = 1 : i64, tpu.core_type = #tpu.core_type<tc>, window_params = [{transform_indices = @transform_0, window_bounds = array<i64: 1, 128, 128>}, {transform_indices = @transform_1, window_bounds = array<i64: 1, 128, 1>}, {pipeline_mode = #tpu.pipeline_mode<synchronous>, transform_indices = @transform_2, window_bounds = array<i64: 128, 128>}, {transform_indices = @transform_3, window_bounds = array<i64: 1, 128, 128>}, {pipeline_mode = #tpu.pipeline_mode<synchronous>, transform_indices = @transform_4, window_bounds = array<i64: 128, 128>}, {pipeline_mode = #tpu.pipeline_mode<synchronous>, transform_indices = @transform_5, window_bounds = array<i64: 1, 128>}, {transform_indices = @transform_6, window_bounds = array<i64: 128, 128>}]} {
    %c0_i32 = arith.constant 0 : i32
    %0 = arith.cmpi eq, %arg1, %c0_i32 : i32
    %1 = arith.extui %0 : i1 to i32
    %c0_i32_0 = arith.constant 0 : i32
    %2 = arith.cmpi ne, %1, %c0_i32_0 : i32
    scf.if %2 {
      %c128_i32 = arith.constant 128 : i32
      %23 = arith.muli %arg0, %c128_i32 : i32
      %24 = tpu.assume_multiple %23, 128 : i32
      %25 = arith.index_cast %24 : i32 to index
      %c0_17 = arith.constant 0 : index
      %26 = vector.load %arg4[%25, %c0_17] : memref<128x128xbf16, #tpu.memory_space<vmem>>, vector<128x128xbf16>
      %c0_18 = arith.constant 0 : index
      %c0_19 = arith.constant 0 : index
      %27 = vector.load %arg6[%c0_18, %c0_19] : memref<128x128xbf16, #tpu.memory_space<vmem>>, vector<128x128xbf16>
      %cst_20 = arith.constant dense<0.000000e+00> : vector<128x128xf32>
      %28 = tpu.matmul %26, %27, %cst_20 {dimension_numbers = #tpu.dot_dimension_numbers<[1], [0], [0], [1], [0, 0, 1, 1], [], []>} : vector<128x128xbf16>, vector<128x128xbf16>, vector<128x128xf32> -> vector<128x128xf32>
      %c0_21 = arith.constant 0 : index
      %c0_22 = arith.constant 0 : index
      %29 = vector.load %arg7[%c0_21, %c0_22] : memref<1x128xf32, #tpu.memory_space<vmem>>, vector<1x128xf32>
      %30 = vector.broadcast %29 : vector<1x128xf32> to vector<128x128xf32>
      %31 = arith.addf %28, %30 : vector<128x128xf32>
      %c0_23 = arith.constant 0 : index
      %c0_24 = arith.constant 0 : index
      %32 = vector.load %arg9[%c0_23, %c0_24] : memref<128x128xf32, #tpu.memory_space<vmem>>, vector<128x128xf32>
      tpu.vector_store %arg9[%c0_23, %c0_24], %31 {strides = array<i32>} : memref<128x128xf32, #tpu.memory_space<vmem>>, vector<128x128xf32>,
    } else {
    }
    %c0 = arith.constant 0 : index
    %c0_1 = arith.constant 0 : index
    %c0_2 = arith.constant 0 : index
    %3 = vector.load %arg2[%c0, %c0_1, %c0_2] : memref<1x128x128xi8, #tpu.memory_space<vmem>>, vector<1x128x128xi8>
    %4 = vector.shape_cast %3 : vector<1x128x128xi8> to vector<128x128xi8>
    %5 = arith.sitofp %4 : vector<128x128xi8> to vector<128x128xf32>
    %6 = arith.truncf %5 : vector<128x128xf32> to vector<128x128xbf16>
    %c0_3 = arith.constant 0 : index
    %c0_4 = arith.constant 0 : index
    %7 = vector.load %arg4[%c0_3, %c0_4] : memref<128x128xbf16, #tpu.memory_space<vmem>>, vector<128x128xbf16>
    %cst = arith.constant dense<0.000000e+00> : vector<128x128xf32>
    %8 = tpu.matmul %6, %7, %cst {dimension_numbers = #tpu.dot_dimension_numbers<[1], [0], [0], [1], [0, 0, 1, 1], [], []>} : vector<128x128xbf16>, vector<128x128xbf16>, vector<128x128xf32> -> vector<128x128xf32>
    %9 = arith.truncf %8 : vector<128x128xf32> to vector<128x128xbf16>
    %c0_5 = arith.constant 0 : index
    %c0_6 = arith.constant 0 : index
    %c0_7 = arith.constant 0 : index
    %10 = vector.load %arg5[%c0_5, %c0_6, %c0_7] : memref<1x128x128xbf16, #tpu.memory_space<vmem>>, vector<1x128x128xbf16>
    %11 = vector.shape_cast %10 : vector<1x128x128xbf16> to vector<128x128xbf16>
    %cst_8 = arith.constant dense<0.000000e+00> : vector<128x128xf32>
    %12 = tpu.matmul %9, %11, %cst_8 {dimension_numbers = #tpu.dot_dimension_numbers<[1], [0], [0], [1], [0, 0, 1, 1], [], []>} : vector<128x128xbf16>, vector<128x128xbf16>, vector<128x128xf32> -> vector<128x128xf32>
    %c0_9 = arith.constant 0 : index
    %c0_10 = arith.constant 0 : index
    %13 = vector.load %arg9[%c0_9, %c0_10] : memref<128x128xf32, #tpu.memory_space<vmem>>, vector<128x128xf32>
    %c0_11 = arith.constant 0 : index
    %c0_12 = arith.constant 0 : index
    %c0_13 = arith.constant 0 : index
    %14 = vector.load %arg3[%c0_11, %c0_12, %c0_13] : memref<1x128x1xf32, #tpu.memory_space<vmem>>, vector<1x128x1xf32>
    %15 = vector.shape_cast %14 : vector<1x128x1xf32> to vector<128x1xf32>
    %16 = vector.broadcast %15 : vector<128x1xf32> to vector<128x128xf32>
    %17 = arith.mulf %16, %12 : vector<128x128xf32>
    %18 = arith.addf %13, %17 : vector<128x128xf32>
    %c0_14 = arith.constant 0 : index
    %c0_15 = arith.constant 0 : index
    %19 = vector.load %arg9[%c0_14, %c0_15] : memref<128x128xf32, #tpu.memory_space<vmem>>, vector<128x128xf32>
    tpu.vector_store %arg9[%c0_14, %c0_15], %18 {strides = array<i32>} : memref<128x128xf32, #tpu.memory_space<vmem>>, vector<128x128xf32>,
    %c2_i32 = arith.constant 2 : i32
    %20 = arith.cmpi eq, %arg1, %c2_i32 : i32
    %21 = arith.extui %20 : i1 to i32
    %c0_i32_16 = arith.constant 0 : i32
    %22 = arith.cmpi ne, %21, %c0_i32_16 : i32
    scf.if %22 {
      %c0_17 = arith.constant 0 : index
      %c0_18 = arith.constant 0 : index
      %23 = vector.load %arg9[%c0_17, %c0_18] : memref<128x128xf32, #tpu.memory_space<vmem>>, vector<128x128xf32>
      %24 = tpu.iota {dimensions = array<i32: 1>} : vector<128x128xi32>
      %c4_i32 = arith.constant 4 : i32
      %25 = vector.broadcast %c4_i32 : i32 to vector<128x128xi32>
      %26 = arith.cmpi slt, %24, %25 : vector<128x128xi32>
      %cst_19 = arith.constant -1.000000e+30 : f32
      %27 = vector.broadcast %cst_19 : f32 to vector<128x128xf32>
      %28 = arith.select %26, %23, %27 : vector<128x128xi1>, vector<128x128xf32>
      %cst_20 = arith.constant dense<0xFF800000> : vector<128xf32>
      %29 = vector.multi_reduction <maximumf>, %28, %cst_20 [1] : vector<128x128xf32> to vector<128xf32>
      %30 = vector.shape_cast %29 : vector<128xf32> to vector<128x1xf32>
      %31 = vector.broadcast %30 : vector<128x1xf32> to vector<128x128xf32>
      %32 = arith.subf %28, %31 : vector<128x128xf32>
      %33 = math.exp %32 : vector<128x128xf32>
      %cst_21 = arith.constant dense<0.000000e+00> : vector<128xf32>
      %34 = vector.multi_reduction <add>, %33, %cst_21 [1] : vector<128x128xf32> to vector<128xf32>
      %35 = vector.shape_cast %34 : vector<128xf32> to vector<128x1xf32>
      %36 = math.log %35 : vector<128x1xf32>
      %37 = vector.broadcast %36 : vector<128x1xf32> to vector<128x128xf32>
      %38 = arith.subf %32, %37 : vector<128x128xf32>
      %c0_22 = arith.constant 0 : index
      %c0_23 = arith.constant 0 : index
      %39 = vector.load %arg8[%c0_22, %c0_23] : memref<128x128xf32, #tpu.memory_space<vmem>>, vector<128x128xf32>
      tpu.vector_store %arg8[%c0_22, %c0_23], %38 {strides = array<i32>} : memref<128x128xf32, #tpu.memory_space<vmem>>, vector<128x128xf32>,
    } else {
    }
    return
  }
  func.func @transform_0(%arg0: i32, %arg1: i32) -> (i32, i32, i32) {
    %c0_i32 = arith.constant 0 : i32
    %c0_i32_0 = arith.constant 0 : i32
    return %arg1, %arg0, %c0_i32 : i32, i32, i32
  }
  func.func @transform_1(%arg0: i32, %arg1: i32) -> (i32, i32, i32) {
    %c0_i32 = arith.constant 0 : i32
    %c0_i32_0 = arith.constant 0 : i32
    return %arg1, %arg0, %c0_i32 : i32, i32, i32
  }
  func.func @transform_2(%arg0: i32, %arg1: i32) -> (i32, i32) {
    %c0_i32 = arith.constant 0 : i32
    %c0_i32_0 = arith.constant 0 : i32
    %c0_i32_1 = arith.constant 0 : i32
    return %c0_i32, %c0_i32_0 : i32, i32
  }
  func.func @transform_3(%arg0: i32, %arg1: i32) -> (i32, i32, i32) {
    %c0_i32 = arith.constant 0 : i32
    %c0_i32_0 = arith.constant 0 : i32
    %c0_i32_1 = arith.constant 0 : i32
    return %arg1, %c0_i32, %c0_i32_0 : i32, i32, i32
  }
  func.func @transform_4(%arg0: i32, %arg1: i32) -> (i32, i32) {
    %c0_i32 = arith.constant 0 : i32
    %c0_i32_0 = arith.constant 0 : i32
    %c0_i32_1 = arith.constant 0 : i32
    return %c0_i32, %c0_i32_0 : i32, i32
  }
  func.func @transform_5(%arg0: i32, %arg1: i32) -> (i32, i32) {
    %c0_i32 = arith.constant 0 : i32
    %c0_i32_0 = arith.constant 0 : i32
    %c0_i32_1 = arith.constant 0 : i32
    return %c0_i32, %c0_i32_0 : i32, i32
  }
  func.func @transform_6(%arg0: i32, %arg1: i32) -> (i32, i32) {
    %c0_i32 = arith.constant 0 : i32
    %c0_i32_0 = arith.constant 0 : i32
    return %arg0, %c0_i32 : i32, i32
  }
}

</mosaic_0001>

<bundles_post_ra>
// kernel: fast_rgcn_forward.2
= control target key start
LH: loop header
LB: loop body
LE: loop exit
PB: predicated region body
PF: predicated region fallthrough
CT: control target
= control target key end

     0   :  { %s1573_s21 = smov 0   ;;  %s1575_s22 = smov 0   ;;  %s1736_s0 = inlined_call_operand.vmem [shape: s8[3,128,128], index: 0, kind: input, shape index: {}]   ;;  %s1737_s1 = inlined_call_operand.vmem [shape: f32[3,128,1], index: 1, kind: input, shape index: {}]   ;;  %s1738_s2 = inlined_call_operand.vmem [shape: bf16[128,8], index: 2, kind: input, shape index: {}]   ;;  %s1739_s3 = inlined_call_operand.vmem [shape: bf16[3,8,128], index: 3, kind: input, shape index: {}]   ;;  %s1740_s4 = inlined_call_operand.vmem [shape: bf16[8,128], index: 4, kind: input, shape index: {}]   ;;  %s1741_s5 = inlined_call_operand.vmem [shape: f32[1,128], index: 5, kind: input, shape index: {}]   ;;  %s1742_s6 = inlined_call_operand.vmem [shape: bf16[128,128], index: 6, kind: output, shape index: {}]  }
   0x1   :  { %s1577_s23 = smov 0  }
   0x2 LB: > { %s25_s24 = sadd.s32 1, %s1531_s22  ;;  %p1237_p0 = scmp.ge.s32.totalorder %s1535_s23, 1  ;;  %s1535_s23 = sphi %s1577_s23, %s16_s23   ;;  %s1531_s22 = sphi %s1575_s22, %s1744_s22   ;;  %s1527_s21 = sphi %s1573_s21, %s1743_s21  }
   0x3   : > { %p26_p1 = scmp.ge.s32.totalorder %s25_s24, 3  ;;  %p257_p2 = scmp.lt.s32.totalorder %s1535_s23, 4 }
   0x5   : > { %s1746_s24 = smov (%p26_p1, %s25_s24), 0  ;;  %p258_p3 = pnand %p1237_p0, %p257_p2 }
   0x6   : > { %p305_p4 = scmp.lt.s32.totalorder (!%p258_p3), %s1527_s21, 2  ;;  %p1243_p5 = scmp.ne.s32.totalorder (!%p258_p3), %s1527_s21, 0 }
   0x7   : > { %261 = sbr.rel (%p258_p3) target bundleno = 753 (0x2f1), region = 44 }
   0xe   : > { %s306_s25 = scalar_select %p305_p4, %s1527_s21, 2 }
   0xf   : > { %338 = sbr.rel (%p1243_p5) target bundleno = 246 (0xf6), region = 48  ;;  %v360_v0 = vld [vmem:[%s1740_s4] sm:$0xf] (!%p1243_p5)  ;;  %vm433_vm0 = vcmask (!%p1243_p5), 1043456   ;;  %vm408_vm1 = vcmask (!%p1243_p5), 64512   ;;  %v1497_v4 = vld [vmem:[%s1738_s2 + $0x8] sm:$0xff] (!%p1243_p5)  }
  0x10   : > { %s1298_s26 = sshll.u32 %s306_s25, 5  ;;  %s1299_s27 = sshll.u32 %s306_s25, 7  ;;  %v1495_v1 = vld [vmem:[%s1738_s2] sm:$0xff] (!%p1243_p5)   ;;  %1467 = vmatprep.subr.msk.bf16.mxu0 (!%p1243_p5), %vm433_vm0, %v360_v0  ;;  %1468 = vmatprep.subr.msk.bf16.mxu1 (!%p1243_p5), %vm433_vm0, %v360_v0  ;;  %v435_v2 = vsel (!%p1243_p5), %vm433_vm0, %v360_v0, 0  ;;  %v1498_v5 = vld [vmem:[%s1738_s2 + $0x28] sm:$0xff] (!%p1243_p5)   ;;  %v1499_v6 = vld [vmem:[%s1738_s2 + $0x10] sm:$0xff] (!%p1243_p5)  }
  0x11   : > { %s1598_s30 = scalar_lea.vmem %s1736_s0, %s1298_s26  ;;  %s1603_s9 = scalar_lea.vmem %s1737_s1, %s1299_s27  ;;  %1398 = vmatpush3.bf16.msra.mxu0 (!%p1243_p5), %v435_v2  ;;  %1466 = vmatpush3.bf16.msra.mxu1 (!%p1243_p5), %v435_v2  ;;  %v1496_v3 = vld [vmem:[%s1738_s2 + $0x20] sm:$0xff] (!%p1243_p5)   ;;  %v1500_v7 = vld [vmem:[%s1738_s2 + $0x30] sm:$0xff] (!%p1243_p5)   ;;  %v1501_v8 = vld [vmem:[%s1738_s2 + $0x18] sm:$0xff] (!%p1243_p5)  }
  0x12   : > { %s1242_s10 = sshll.u32 %s306_s25, 2  ;;  %1399 = vmatprep.mubr.msk.bf16.mxu0 (!%p1243_p5), %vm408_vm1, %v1495_v1  ;;  %1407 = vmatprep.mubr.msk.bf16.mxu1 (!%p1243_p5), %vm408_vm1, %v1496_v3  ;;  %v1502_v9 = vld [vmem:[%s1738_s2 + $0x38] sm:$0xff] (!%p1243_p5)   ;;  %v1244_v10 = vld [vmem:[%s1741_s5] ss:$0 sm:$0xff] (!%p1243_p5) }
  0x13   : > { %s1608_s13 = scalar_lea.vmem %s1739_s3, %s1242_s10 }
  0x14   : > { %1400 = vmatmul.mubr.msk.bf16.vlgmr.msra.gmra.mrb[0].mxu0 (!%p1243_p5), %vm408_vm1, %v1497_v4  ;;  %1408 = vmatmul.mubr.msk.bf16.vlgmr.msra.gmra.mrb[0].mxu1 (!%p1243_p5), %vm408_vm1, %v1498_v5 }
  0x15   : > { %1403 = vmatprep.mubr.msk.bf16.mxu0 (!%p1243_p5), %vm408_vm1, %v1499_v6  ;;  %1411 = vmatprep.mubr.msk.bf16.mxu1 (!%p1243_p5), %vm408_vm1, %v1500_v7 }
  0x1c   : > { %1404 = vmatmul.mubr.msk.bf16.gmra.mrb[4].mxu0 %vm408_vm1, %v1501_v8  ;;  %1412 = vmatmul.mubr.msk.bf16.gmra.mrb[4].mxu1 %vm408_vm1, %v1502_v9 }
  0xe7   : > { %v1401_v11 = vpop.f32.mrb[0].mxu0  ;;  %v1409_v13 = vpop.f32.mrb[0].mxu1 }
  0xe8   : > { %v480_v12 = vadd.f32 %v1401_v11, %v1244_v10  ;;  %v471_v14 = vpop.f32.mrb[1].mxu0  ;;  %v512_v15 = vadd.f32 %v1409_v13, %v1244_v10  ;;  %v503_v17 = vpop.f32.mrb[1].mxu1 }
  0xe9   : > { %v472_v16 = vadd.f32 %v1244_v10, %v471_v14  ;;  %v1402_v18 = vpop.f32.mrb[2].mxu0  ;;  %v504_v19 = vadd.f32 %v1244_v10, %v503_v17  ;;  %v1410_v21 = vpop.f32.mrb[2].mxu1 }
  0xea   : > { %536 = vst [vmem:[#allocation2 + $0x10] sm:$0xff] %v480_v12  ;;  %v483_v20 = vadd.f32 %v1402_v18, %v1244_v10  ;;  %v474_v22 = vpop.f32.mrb[3].mxu0  ;;  %544 = vst [vmem:[#allocation2 + $0x50] sm:$0xff] %v512_v15  ;;  %v515_v23 = vadd.f32 %v1410_v21, %v1244_v10  ;;  %v506_v25 = vpop.f32.mrb[3].mxu1 }
  0xeb   : > { %534 = vst [vmem:[#allocation2] sm:$0xff] %v472_v16  ;;  %v475_v24 = vadd.f32 %v1244_v10, %v474_v22  ;;  %542 = vst [vmem:[#allocation2 + $0x40] sm:$0xff] %v504_v19  ;;  %v507_v26 = vadd.f32 %v1244_v10, %v506_v25 }
  0xec   : > { %537 = vst [vmem:[#allocation2 + $0x18] sm:$0xff] %v483_v20  ;;  %545 = vst [vmem:[#allocation2 + $0x58] sm:$0xff] %v515_v23 }
  0xed   : > { %535 = vst [vmem:[#allocation2 + $0x8] sm:$0xff] %v475_v24  ;;  %543 = vst [vmem:[#allocation2 + $0x48] sm:$0xff] %v507_v26 }
  0xef   : > { %v1405_v27 = vpop.f32.mrb[4].mxu0  ;;  %v1413_v29 = vpop.f32.mrb[4].mxu1 }
  0xf0   : > { %v496_v28 = vadd.f32 %v1405_v27, %v1244_v10  ;;  %v487_v30 = vpop.f32.mrb[5].mxu0  ;;  %v528_v31 = vadd.f32 %v1413_v29, %v1244_v10  ;;  %v519_v33 = vpop.f32.mrb[5].mxu1 }
  0xf1   : > { %v488_v32 = vadd.f32 %v1244_v10, %v487_v30  ;;  %v1406_v34 = vpop.f32.mrb[6].mxu0  ;;  %v520_v35 = vadd.f32 %v1244_v10, %v519_v33  ;;  %v1414_v37 = vpop.f32.mrb[6].mxu1 }
  0xf2   : > { %540 = vst [vmem:[#allocation2 + $0x30] sm:$0xff] %v496_v28  ;;  %v499_v36 = vadd.f32 %v1406_v34, %v1244_v10  ;;  %v490_v38 = vpop.f32.mrb[7].mxu0  ;;  %548 = vst [vmem:[#allocation2 + $0x70] sm:$0xff] %v528_v31  ;;  %v531_v39 = vadd.f32 %v1414_v37, %v1244_v10  ;;  %v522_v41 = vpop.f32.mrb[7].mxu1 }
  0xf3   : > { %538 = vst [vmem:[#allocation2 + $0x20] sm:$0xff] %v488_v32  ;;  %v491_v40 = vadd.f32 %v1244_v10, %v490_v38  ;;  %546 = vst [vmem:[#allocation2 + $0x60] sm:$0xff] %v520_v35  ;;  %v523_v42 = vadd.f32 %v1244_v10, %v522_v41 }
  0xf4   : > { %541 = vst [vmem:[#allocation2 + $0x38] sm:$0xff] %v499_v36  ;;  %549 = vst [vmem:[#allocation2 + $0x78] sm:$0xff] %v531_v39 }
  0xf5   : > { %539 = vst [vmem:[#allocation2 + $0x28] sm:$0xff] %v491_v40  ;;  %547 = vst [vmem:[#allocation2 + $0x68] sm:$0xff] %v523_v42 }
  0xf6 PF: > { %v1505_v43 = vld [vmem:[%s1738_s2] sm:$0xff]   ;;  %v1506_v44 = vld [vmem:[%s1738_s2 + $0x8] sm:$0xff]   ;;  %v1507_v45 = vld [vmem:[%s1738_s2 + $0x10] sm:$0xff]   ;;  %vm757_vm2 = vcmask 1043456   ;;  %v1537_v3 = vmov 0   ;;  %vm732_vm3 = vcmask 64512  }
  0xf7   : > { %1415 = vmatprep.subr.bf16.mxu0 %v1505_v43  ;;  %v1508_v46 = vld [vmem:[%s1738_s2 + $0x18] sm:$0xff]   ;;  %v550_v47 = vld [vmem:[%s1598_s30] sm:$0xff]  ;;  %v1510_v50 = vld [vmem:[%s1738_s2 + $0x28] sm:$0xff]   ;;  %1504 = vset.pattern.permute.xlu1 %v1537_v3  ;;  %p1277_p6 = scmp.ne.s32.totalorder %s1527_s21, 2 }
  0xf8   : > { %1416 = vmatpush3.bf16.msra.mxu0 %v1505_v43  ;;  %v554_v48 = vunpack.c.l.s8.bf16 %v550_v47  ;;  %v1509_v49 = vld [vmem:[%s1738_s2 + $0x20] sm:$0xff]   ;;  %v1511_v51 = vld [vmem:[%s1738_s2 + $0x30] sm:$0xff]   ;;  %v1512_v52 = vld [vmem:[%s1738_s2 + $0x38] sm:$0xff]   ;;  %v555_v54 = vunpack.c.h.s8.bf16 %v550_v47  ;;  %1503 = vset.pattern.permute.xlu0 %v1537_v3 }
  0xf9   : > { %1417 = vmatprep.subr.bf16.mxu0 %v1506_v44  ;;  %v551_v53 = vld [vmem:[%s1598_s30 + $0x8] sm:$0xff]  ;;  %v552_v56 = vld [vmem:[%s1598_s30 + $0x10] sm:$0xff]  ;;  %v553_v59 = vld [vmem:[%s1598_s30 + $0x18] sm:$0xff] }
  0xfa   : > { %1431 = vmatprep.mubr.bf16.mxu0 %v554_v48  ;;  %v556_v55 = vunpack.c.l.s8.bf16 %v551_v53  ;;  %v557_v57 = vunpack.c.h.s8.bf16 %v551_v53  ;;  %v558_v58 = vunpack.c.l.s8.bf16 %v552_v56  ;;  %v559_v60 = vunpack.c.h.s8.bf16 %v552_v56  ;;  %v731_v63 = vld [vmem:[%s1608_s13] sm:$0xf]  ;;  %v876_v1 = vld [vmem:[%s1603_s9 + $0x10] sm:$0xff]  ;;  %v877_v4 = vld [vmem:[%s1603_s9 + $0x18] sm:$0xff] }
  0xfb   : > { %v560_v61 = vunpack.c.l.s8.bf16 %v553_v59  ;;  %v561_v62 = vunpack.c.h.s8.bf16 %v553_v59  ;;  %1469 = vmatprep.subr.msk.bf16.mxu1 %vm757_vm2, %v731_v63  ;;  %v759_v0 = vsel %vm757_vm2, %v731_v63, 0  ;;  %v874_v2 = vld [vmem:[%s1603_s9] sm:$0xff]  ;;  %902 = vperm.xlu1 %1504, %v876_v1   ;;  %v875_v5 = vld [vmem:[%s1603_s9 + $0x8] sm:$0xff]  ;;  %v881_v8 = vld [vmem:[%s1603_s9 + $0x38] sm:$0xff] }
  0xfc   : > { %1418 = vmatpush3.bf16.msra.mxu0 %v1506_v44  ;;  %1448 = vmatpush3.bf16.msra.mxu1 %v759_v0  ;;  %v879_v6 = vld [vmem:[%s1603_s9 + $0x28] sm:$0xff]  ;;  %v878_v7 = vld [vmem:[%s1603_s9 + $0x20] sm:$0xff]  ;;  %v880_v9 = vld [vmem:[%s1603_s9 + $0x30] sm:$0xff] }
  0xfd   : > { %1419 = vmatprep.subr.bf16.mxu0 %v1507_v45  ;;  %892 = vperm.xlu0 %1503, %v874_v2   ;;  %v883_v10 = vld [vmem:[%s1603_s9 + $0x48] sm:$0xff]  ;;  %v882_v11 = vld [vmem:[%s1603_s9 + $0x40] sm:$0xff]  ;;  %v885_v12 = vld [vmem:[%s1603_s9 + $0x58] sm:$0xff] }
  0xfe   : > { %v884_v13 = vld [vmem:[%s1603_s9 + $0x50] sm:$0xff]  ;;  %v887_v14 = vld [vmem:[%s1603_s9 + $0x68] sm:$0xff]  ;;  %v886_v15 = vld [vmem:[%s1603_s9 + $0x60] sm:$0xff] }
  0xff   : > { %907 = vperm.xlu1 %1504, %v877_v4   ;;  %v889_v16 = vld [vmem:[%s1603_s9 + $0x78] sm:$0xff]  ;;  %v888_v17 = vld [vmem:[%s1603_s9 + $0x70] sm:$0xff]  ;;  %v858_v53 = vld [vmem:[#allocation2] sm:$0xff] }
 0x100   : > { %1420 = vmatpush3.bf16.msra.mxu0 %v1507_v45 }
 0x101   : > { %1421 = vmatprep.subr.bf16.mxu0 %v1508_v46  ;;  %897 = vperm.xlu0 %1503, %v875_v5   ;;  %v864_v5 = vld [vmem:[#allocation2 + $0x30] sm:$0xff] }
 0x103   : > { %917 = vperm.xlu1 %1504, %v879_v6  }
 0x104   : > { %1422 = vmatpush3.bf16.msra.mxu0 %v1508_v46 }
 0x105   : > { %1423 = vmatprep.subr.bf16.mxu0 %v1509_v49  ;;  %912 = vperm.xlu0 %1503, %v878_v7  }
 0x107   : > { %927 = vperm.xlu1 %1504, %v881_v8   ;;  %v862_v8 = vld [vmem:[#allocation2 + $0x20] sm:$0xff] }
 0x108   : > { %1424 = vmatpush3.bf16.msra.mxu0 %v1509_v49 }
 0x109   : > { %1425 = vmatprep.subr.bf16.mxu0 %v1510_v50  ;;  %922 = vperm.xlu0 %1503, %v880_v9  }
 0x10b   : > { %937 = vperm.xlu1 %1504, %v883_v10  }
 0x10c   : > { %1426 = vmatpush3.bf16.msra.mxu0 %v1510_v50  ;;  %v860_v50 = vld [vmem:[#allocation2 + $0x10] sm:$0xff] }
 0x10d   : > { %1427 = vmatprep.subr.bf16.mxu0 %v1511_v51  ;;  %932 = vperm.xlu0 %1503, %v882_v11   ;;  %v865_v11 = vld [vmem:[#allocation2 + $0x38] sm:$0xff] }
 0x10f   : > { %947 = vperm.xlu1 %1504, %v885_v12  }
 0x110   : > { %1428 = vmatpush3.bf16.msra.mxu0 %v1511_v51 }
 0x111   : > { %1429 = vmatprep.subr.bf16.mxu0 %v1512_v52  ;;  %942 = vperm.xlu0 %1503, %v884_v13  }
 0x113   : > { %957 = vperm.xlu1 %1504, %v887_v14  }
 0x114   : > { %1430 = vmatpush3.bf16.msra.mxu0 %v1512_v52 }
 0x115   : > { %952 = vperm.xlu0 %1503, %v886_v15   ;;  %v863_v15 = vld [vmem:[#allocation2 + $0x28] sm:$0xff] }
 0x117   : > { %1432 = vmatmul.mubr.bf16.vlgmr.msra.gmra.mrb[0].mxu0 %v555_v54  ;;  %967 = vperm.xlu1 %1504, %v889_v16  }
 0x118   : > { %1435 = vmatprep.mubr.bf16.mxu0 %v556_v55 }
 0x119   : > { %962 = vperm.xlu0 %1503, %v888_v17  }
 0x11f   : > { %1436 = vmatmul.mubr.bf16.gmra.mrb[4].mxu0 %v557_v57  ;;  %v861_v57 = vld [vmem:[#allocation2 + $0x18] sm:$0xff] }
 0x120   : > { %1439 = vmatprep.mubr.bf16.mxu0 %v558_v58 }
 0x127   : > { %1440 = vmatmul.mubr.bf16.gmra.mrb[8].mxu0 %v559_v60 }
 0x128   : > { %1443 = vmatprep.mubr.bf16.mxu0 %v560_v61  ;;  %v859_v61 = vld [vmem:[#allocation2 + $0x8] sm:$0xff] }
 0x12f   : > { %1444 = vmatmul.mubr.bf16.gmra.mrb[12].mxu0 %v561_v62 }
 0x17a   : > { %v903_v43 = vpop.permute.xlu1 %902 }
 0x17c   : > { %v893_v42 = vpop.permute.xlu0 %892 }
 0x17e   : > { %v908_v45 = vpop.permute.xlu1 %907 }
 0x180   : > { %v898_v44 = vpop.permute.xlu0 %897 }
 0x182   : > { %v918_v47 = vpop.permute.xlu1 %917 }
 0x184   : > { %v913_v46 = vpop.permute.xlu0 %912 }
 0x186   : > { %v928_v54 = vpop.permute.xlu1 %927 }
 0x188   : > { %v923_v48 = vpop.permute.xlu0 %922 }
 0x18a   : > { %v938_v3 = vpop.permute.xlu1 %937 }
 0x18c   : > { %v933_v1 = vpop.permute.xlu0 %932 }
 0x190   : > { %v943_v16 = vpop.permute.xlu0 %942 }
 0x1ea   : > { %v1433_v18 = vpop.f32.mrb[0].mxu0 }
 0x1eb   : > { %v660_v19 = vpop.f32.mrb[1].mxu0 }
 0x1ec   : > { %v1434_v20 = vpop.f32.mrb[2].mxu0 }
 0x1ed   : > { %v724_v21 = vpack.c.bf16 %v1434_v20, %v1433_v18  ;;  %v663_v22 = vpop.f32.mrb[3].mxu0  ;;  %v948_v20 = vpop.permute.xlu1 %947 }
 0x1ee   : > { %v723_v23 = vpack.c.bf16 %v663_v22, %v660_v19 }
 0x1f0   : > { %1449 = vmatprep.mubr.msk.bf16.mxu1 %vm732_vm3, %v723_v23  ;;  %v868_v23 = vld [vmem:[#allocation2 + $0x50] sm:$0xff] }
 0x1f1   : > { %1450 = vmatmul.mubr.msk.bf16.vlgmr.msra.gmra.mrb[0].mxu1 %vm732_vm3, %v724_v21 }
 0x1f2   : > { %v1437_v24 = vpop.f32.mrb[4].mxu0 }
 0x1f3   : > { %v676_v25 = vpop.f32.mrb[5].mxu0 }
 0x1f4   : > { %v1438_v26 = vpop.f32.mrb[6].mxu0 }
 0x1f5   : > { %v726_v27 = vpack.c.bf16 %v1438_v26, %v1437_v24  ;;  %v679_v28 = vpop.f32.mrb[7].mxu0  ;;  %v866_v26 = vld [vmem:[#allocation2 + $0x40] sm:$0xff] }
 0x1f6   : > { %v725_v29 = vpack.c.bf16 %v679_v28, %v676_v25 }
 0x1f8   : > { %1453 = vmatprep.mubr.msk.bf16.mxu1 %vm732_vm3, %v725_v29 }
 0x1f9   : > { %1454 = vmatmul.mubr.msk.bf16.gmra.mrb[4].mxu1 %vm732_vm3, %v726_v27  ;;  %v953_v27 = vpop.permute.xlu0 %952 }
 0x1fa   : > { %v1441_v30 = vpop.f32.mrb[8].mxu0 }
 0x1fb   : > { %v692_v31 = vpop.f32.mrb[9].mxu0 }
 0x1fc   : > { %v1442_v32 = vpop.f32.mrb[10].mxu0 }
 0x1fd   : > { %v728_v33 = vpack.c.bf16 %v1442_v32, %v1441_v30  ;;  %v695_v34 = vpop.f32.mrb[11].mxu0  ;;  %v869_v30 = vld [vmem:[#allocation2 + $0x58] sm:$0xff] }
 0x1fe   : > { %v727_v35 = vpack.c.bf16 %v695_v34, %v692_v31  ;;  %v867_v34 = vld [vmem:[#allocation2 + $0x48] sm:$0xff] }
 0x200   : > { %1457 = vmatprep.mubr.msk.bf16.mxu1 %vm732_vm3, %v727_v35  ;;  %v958_v35 = vpop.permute.xlu1 %957 }
 0x201   : > { %1458 = vmatmul.mubr.msk.bf16.gmra.mrb[8].mxu1 %vm732_vm3, %v728_v33 }
 0x202   : > { %v1445_v36 = vpop.f32.mrb[12].mxu0 }
 0x203   : > { %v708_v37 = vpop.f32.mrb[13].mxu0 }
 0x204   : > { %v1446_v38 = vpop.f32.mrb[14].mxu0 }
 0x205   : > { %v730_v39 = vpack.c.bf16 %v1446_v38, %v1445_v36  ;;  %v711_v40 = vpop.f32.mrb[15].mxu0 }
 0x206   : > { %v729_v41 = vpack.c.bf16 %v711_v40, %v708_v37  ;;  %v963_v40 = vpop.permute.xlu0 %962 }
 0x208   : > { %1461 = vmatprep.mubr.msk.bf16.mxu1 %vm732_vm3, %v729_v41 }
 0x209   : > { %1462 = vmatmul.mubr.msk.bf16.gmra.mrb[12].mxu1 %vm732_vm3, %v730_v39 }
 0x2c4   : > { %v1451_v49 = vpop.f32.mrb[0].mxu1 }
 0x2c5   : > { %v972_v51 = vmul.f32 %v1451_v49, %v903_v43  ;;  %v795_v52 = vpop.f32.mrb[1].mxu1  ;;  %v873_v49 = vld [vmem:[#allocation2 + $0x78] sm:$0xff] }
 0x2c6   : > { %v970_v55 = vmul.f32 %v893_v42, %v795_v52  ;;  %v1452_v56 = vpop.f32.mrb[2].mxu1  ;;  %v872_v42 = vld [vmem:[#allocation2 + $0x70] sm:$0xff] }
 0x2c7   : > { %v988_v58 = vadd.f32 %v972_v51, %v860_v50  ;;  %v973_v59 = vmul.f32 %v1452_v56, %v908_v45  ;;  %v798_v60 = vpop.f32.mrb[3].mxu1  ;;  %v870_v45 = vld [vmem:[#allocation2 + $0x60] sm:$0xff] }
 0x2c8   : > { %v986_v62 = vadd.f32 %v970_v55, %v858_v53  ;;  %v971_v63 = vmul.f32 %v898_v44, %v798_v60  ;;  %v871_v53 = vld [vmem:[#allocation2 + $0x68] sm:$0xff] }
 0x2c9   : > { %1004 = vst [vmem:[#allocation2 + $0x10] sm:$0xff] %v988_v58  ;;  %v989_v0 = vadd.f32 %v973_v59, %v861_v57 }
 0x2ca   : > { %1002 = vst [vmem:[#allocation2] sm:$0xff] %v986_v62  ;;  %v987_v2 = vadd.f32 %v971_v63, %v859_v61 }
 0x2cb   : > { %1005 = vst [vmem:[#allocation2 + $0x18] sm:$0xff] %v989_v0 }
 0x2cc   : > { %1003 = vst [vmem:[#allocation2 + $0x8] sm:$0xff] %v987_v2  ;;  %v1455_v4 = vpop.f32.mrb[4].mxu1 }
 0x2cd   : > { %v976_v6 = vmul.f32 %v1455_v4, %v923_v48  ;;  %v811_v7 = vpop.f32.mrb[5].mxu1 }
 0x2ce   : > { %v974_v9 = vmul.f32 %v913_v46, %v811_v7  ;;  %v1456_v10 = vpop.f32.mrb[6].mxu1  ;;  %v968_v46 = vpop.permute.xlu1 %967 }
 0x2cf   : > { %v992_v12 = vadd.f32 %v976_v6, %v864_v5  ;;  %v977_v13 = vmul.f32 %v1456_v10, %v928_v54  ;;  %v814_v14 = vpop.f32.mrb[7].mxu1 }
 0x2d0   : > { %v990_v17 = vadd.f32 %v974_v9, %v862_v8  ;;  %v975_v18 = vmul.f32 %v918_v47, %v814_v14  ;;  %v1024_v60 = vld [vmem:[#allocation2 + $0x10] sm:$0xff] (!%p1277_p6) }
 0x2d1   : > { %1008 = vst [vmem:[#allocation2 + $0x30] sm:$0xff] %v992_v12  ;;  %v993_v19 = vadd.f32 %v977_v13, %v865_v11  ;;  %v1022_v58 = vld [vmem:[#allocation2] sm:$0xff] (!%p1277_p6)  ;;  %v1040_v0 = vmax.f32 (!%p1277_p6), %v1024_v60, 0.0 }
 0x2d2   : > { %1006 = vst [vmem:[#allocation2 + $0x20] sm:$0xff] %v990_v17  ;;  %v991_v21 = vadd.f32 %v975_v18, %v863_v15  ;;  %v1038_v61 = vmax.f32 (!%p1277_p6), %v1022_v58, 0.0  ;;  %v1025_v63 = vld [vmem:[#allocation2 + $0x18] sm:$0xff] (!%p1277_p6) }
 0x2d3   : > { %1009 = vst [vmem:[#allocation2 + $0x38] sm:$0xff] %v993_v19  ;;  %v1023_v59 = vld [vmem:[#allocation2 + $0x8] sm:$0xff] (!%p1277_p6) }
 0x2d4   : > { %1007 = vst [vmem:[#allocation2 + $0x28] sm:$0xff] %v991_v21  ;;  %v1459_v22 = vpop.f32.mrb[8].mxu1  ;;  %v1039_v62 = vmax.f32 (!%p1277_p6), %v1023_v59, 0.0 }
 0x2d5   : > { %v980_v24 = vmul.f32 %v1459_v22, %v943_v16  ;;  %v827_v25 = vpop.f32.mrb[9].mxu1 }
 0x2d6   : > { %v978_v28 = vmul.f32 %v933_v1, %v827_v25  ;;  %v1460_v29 = vpop.f32.mrb[10].mxu1  ;;  %v1319_v9 = vpack.c.bf16 (!%p1277_p6), %v1039_v62, %v1038_v61 }
 0x2d7   : > { %v996_v31 = vadd.f32 %v980_v24, %v868_v23  ;;  %v981_v32 = vmul.f32 %v1460_v29, %v948_v20  ;;  %v830_v33 = vpop.f32.mrb[11].mxu1 }
 0x2d8   : > { %v994_v36 = vadd.f32 %v978_v28, %v866_v26  ;;  %v979_v37 = vmul.f32 %v938_v3, %v830_v33  ;;  %v1041_v3 = vmax.f32 (!%p1277_p6), %v1025_v63, 0.0  ;;  %v1028_v6 = vld [vmem:[#allocation2 + $0x30] sm:$0xff] (!%p1277_p6)  ;;  %1320 = vst [vmem:[%s1742_s6] sm:$0xff] (!%p1277_p6), %v1319_v9  }
 0x2d9   : > { %1012 = vst [vmem:[#allocation2 + $0x50] sm:$0xff] %v996_v31  ;;  %v997_v38 = vadd.f32 %v981_v32, %v869_v30  ;;  %v1026_v1 = vld [vmem:[#allocation2 + $0x20] sm:$0xff] (!%p1277_p6)  ;;  %v1044_v10 = vmax.f32 (!%p1277_p6), %v1028_v6, 0.0 }
 0x2da   : > { %1010 = vst [vmem:[#allocation2 + $0x40] sm:$0xff] %v994_v36  ;;  %v995_v39 = vadd.f32 %v979_v37, %v867_v34  ;;  %v1042_v4 = vmax.f32 (!%p1277_p6), %v1026_v1, 0.0  ;;  %v1029_v7 = vld [vmem:[#allocation2 + $0x38] sm:$0xff] (!%p1277_p6)  ;;  %v1324_v16 = vpack.c.bf16 (!%p1277_p6), %v1041_v3, %v1040_v0 }
 0x2db   : > { %1013 = vst [vmem:[#allocation2 + $0x58] sm:$0xff] %v997_v38  ;;  %v1027_v2 = vld [vmem:[#allocation2 + $0x28] sm:$0xff] (!%p1277_p6)  ;;  %v1045_v11 = vmax.f32 (!%p1277_p6), %v1029_v7, 0.0 }
 0x2dc   : > { %1011 = vst [vmem:[#allocation2 + $0x48] sm:$0xff] %v995_v39  ;;  %v1463_v41 = vpop.f32.mrb[12].mxu1  ;;  %v1043_v5 = vmax.f32 (!%p1277_p6), %v1027_v2, 0.0  ;;  %1356 = vst [vmem:[%s1742_s6 + $0x8] sm:$0xff] (!%p1277_p6), %v1324_v16  }
 0x2dd   : > { %v984_v43 = vmul.f32 %v1463_v41, %v963_v40  ;;  %v843_v44 = vpop.f32.mrb[13].mxu1  ;;  %v1334_v23 = vpack.c.bf16 (!%p1277_p6), %v1045_v11, %v1044_v10 }
 0x2de   : > { %v982_v47 = vmul.f32 %v953_v27, %v843_v44  ;;  %v1464_v48 = vpop.f32.mrb[14].mxu1  ;;  %1021 = sbr.rel (%p1277_p6) target bundleno = 753 (0x2f1), region = 52  ;;  %v1329_v17 = vpack.c.bf16 (!%p1277_p6), %v1043_v5, %v1042_v4 }
 0x2df   : > { %v1000_v50 = vadd.f32 %v984_v43, %v872_v42  ;;  %v985_v51 = vmul.f32 %v1464_v48, %v968_v46  ;;  %v846_v52 = vpop.f32.mrb[15].mxu1  ;;  %1358 = vst [vmem:[%s1742_s6 + $0x18] sm:$0xff] (!%p1277_p6), %v1334_v23  }
 0x2e0   : > { %v998_v54 = vadd.f32 %v982_v47, %v870_v45  ;;  %v983_v55 = vmul.f32 %v958_v35, %v846_v52  ;;  %v1032_v14 = vld [vmem:[#allocation2 + $0x50] sm:$0xff] (!%p1277_p6)  ;;  %1357 = vst [vmem:[%s1742_s6 + $0x10] sm:$0xff] (!%p1277_p6), %v1329_v17  }
 0x2e1   : > { %1016 = vst [vmem:[#allocation2 + $0x70] sm:$0xff] %v1000_v50  ;;  %v1001_v56 = vadd.f32 %v985_v51, %v873_v49  ;;  %v1030_v8 = vld [vmem:[#allocation2 + $0x40] sm:$0xff] (!%p1277_p6)  ;;  %v1048_v19 = vmax.f32 (!%p1277_p6), %v1032_v14, 0.0 }
 0x2e2   : > { %1014 = vst [vmem:[#allocation2 + $0x60] sm:$0xff] %v998_v54  ;;  %v999_v57 = vadd.f32 %v983_v55, %v871_v53  ;;  %v1046_v13 = vmax.f32 (!%p1277_p6), %v1030_v8, 0.0  ;;  %v1033_v15 = vld [vmem:[#allocation2 + $0x58] sm:$0xff] (!%p1277_p6) }
 0x2e3   : > { %1017 = vst [vmem:[#allocation2 + $0x78] sm:$0xff] %v1001_v56  ;;  %v1031_v12 = vld [vmem:[#allocation2 + $0x48] sm:$0xff] (!%p1277_p6)  ;;  %v1049_v24 = vmax.f32 (!%p1277_p6), %v1033_v15, 0.0 }
 0x2e4   : > { %1015 = vst [vmem:[#allocation2 + $0x68] sm:$0xff] %v999_v57  ;;  %v1047_v18 = vmax.f32 (!%p1277_p6), %v1031_v12, 0.0 }
 0x2e5   : > { %v1344_v31 = vpack.c.bf16 %v1049_v24, %v1048_v19 }
 0x2e6   : > { %v1339_v28 = vpack.c.bf16 %v1047_v18, %v1046_v13 }
 0x2e7   : > { %1360 = vst [vmem:[%s1742_s6 + $0x28] sm:$0xff] %v1344_v31  }
 0x2e8   : > { %v1036_v22 = vld [vmem:[#allocation2 + $0x70] sm:$0xff]  ;;  %1359 = vst [vmem:[%s1742_s6 + $0x20] sm:$0xff] %v1339_v28  }
 0x2e9   : > { %v1034_v20 = vld [vmem:[#allocation2 + $0x60] sm:$0xff]  ;;  %v1052_v29 = vmax.f32 %v1036_v22, 0.0 }
 0x2ea   : > { %v1050_v25 = vmax.f32 %v1034_v20, 0.0  ;;  %v1037_v27 = vld [vmem:[#allocation2 + $0x78] sm:$0xff] }
 0x2eb   : > { %v1035_v21 = vld [vmem:[#allocation2 + $0x68] sm:$0xff]  ;;  %v1053_v30 = vmax.f32 %v1037_v27, 0.0 }
 0x2ec   : > { %v1051_v26 = vmax.f32 %v1035_v21, 0.0 }
 0x2ed   : > { %v1354_v33 = vpack.c.bf16 %v1053_v30, %v1052_v29 }
 0x2ee   : > { %v1349_v32 = vpack.c.bf16 %v1051_v26, %v1050_v25 }
 0x2ef   : > { %1362 = vst [vmem:[%s1742_s6 + $0x38] sm:$0xff] %v1354_v33  }
 0x2f0   : > { %1361 = vst [vmem:[%s1742_s6 + $0x30] sm:$0xff] %v1349_v32  }
 0x2f1 PF: > { %s16_s23 = sadd.s32 1, %s1535_s23   ;;  %s1743_s21 = smov %s1531_s22 }
 0x2f2   : > { %p13_p7 = scmp.ge.s32.totalorder %s16_s23, 5   ;;  %s1744_s22 = smov %s1746_s24 }
 0x2f4   :  { %15 = sbr.rel (!%p13_p7) target bundleno = 2 (0x2), region = 89 }

// kernel: fast_rgcn_forward.3
= control target key start
LH: loop header
LB: loop body
LE: loop exit
PB: predicated region body
PF: predicated region fallthrough
CT: control target
= control target key end

     0   :  { %s1807_s21 = smov 0   ;;  %s1809_s22 = smov 0   ;;  %s2110_s0 = inlined_call_operand.vmem [shape: s8[3,128,128], index: 0, kind: input, shape index: {}]   ;;  %s2111_s1 = inlined_call_operand.vmem [shape: f32[3,128,1], index: 1, kind: input, shape index: {}]   ;;  %s2112_s2 = inlined_call_operand.vmem [shape: bf16[128,128], index: 2, kind: input, shape index: {}]   ;;  %s2113_s3 = inlined_call_operand.vmem [shape: bf16[3,128,128], index: 3, kind: input, shape index: {}]   ;;  %s2114_s4 = inlined_call_operand.vmem [shape: bf16[128,128], index: 4, kind: input, shape index: {}]   ;;  %s2115_s5 = inlined_call_operand.vmem [shape: f32[1,128], index: 5, kind: input, shape index: {}]   ;;  %s2116_s6 = inlined_call_operand.vmem [shape: f32[128,128], index: 6, kind: output, shape index: {}]  }
   0x1   :  { %s1811_s23 = smov 0  }
   0x2 LB: > { %s25_s24 = sadd.s32 1, %s1765_s22  ;;  %p1415_p0 = scmp.ge.s32.totalorder %s1769_s23, 1  ;;  %s1769_s23 = sphi %s1811_s23, %s16_s23   ;;  %s1765_s22 = sphi %s1809_s22, %s2118_s22   ;;  %s1761_s21 = sphi %s1807_s21, %s2117_s21  }
   0x3   : > { %p26_p1 = scmp.ge.s32.totalorder %s25_s24, 3  ;;  %p258_p2 = scmp.lt.s32.totalorder %s1769_s23, 4 }
   0x5   : > { %s2120_s24 = smov (%p26_p1, %s25_s24), 0  ;;  %p259_p3 = pnand %p1415_p0, %p258_p2 }
   0x6   : > { %p307_p4 = scmp.lt.s32.totalorder (!%p259_p3), %s1761_s21, 2  ;;  %p1422_p5 = scmp.ne.s32.totalorder (!%p259_p3), %s1761_s21, 0 }
   0x7   : > { %262 = sbr.rel (%p259_p3) target bundleno = 1099 (0x44b), region = 44 }
   0xe   : > { %s308_s25 = scalar_select %p307_p4, %s1761_s21, 2 }
   0xf   : > { %341 = sbr.rel (%p1422_p5) target bundleno = 274 (0x112), region = 48  ;;  %v1649_v0 = vld [vmem:[%s2114_s4] sm:$0xff] (!%p1422_p5)   ;;  %v1650_v1 = vld [vmem:[%s2114_s4 + $0x8] sm:$0xff] (!%p1422_p5)   ;;  %v1651_v2 = vld [vmem:[%s2114_s4 + $0x10] sm:$0xff] (!%p1422_p5)  }
  0x10   : > { %s1461_s26 = sshll.u32 %s308_s25, 5  ;;  %s1462_s27 = sshll.u32 %s308_s25, 7  ;;  %1512 = vmatprep.subr.bf16.mxu0 (!%p1422_p5), %v1649_v0  ;;  %1608 = vmatprep.subr.bf16.mxu1 (!%p1422_p5), %v1649_v0  ;;  %v1652_v3 = vld [vmem:[%s2114_s4 + $0x18] sm:$0xff] (!%p1422_p5)   ;;  %v1657_v4 = vld [vmem:[%s2112_s2] sm:$0xff] (!%p1422_p5)   ;;  %v1654_v7 = vld [vmem:[%s2114_s4 + $0x28] sm:$0xff] (!%p1422_p5)  }
  0x11   : > { %s1832_s30 = scalar_lea.vmem %s2110_s0, %s1461_s26  ;;  %s1837_s9 = scalar_lea.vmem %s2111_s1, %s1462_s27  ;;  %1513 = vmatpush3.bf16.msra.mxu0 (!%p1422_p5), %v1649_v0  ;;  %1616 = vmatpush3.bf16.msra.mxu1 (!%p1422_p5), %v1649_v0  ;;  %v1658_v5 = vld [vmem:[%s2112_s2 + $0x20] sm:$0xff] (!%p1422_p5)   ;;  %v1655_v8 = vld [vmem:[%s2114_s4 + $0x30] sm:$0xff] (!%p1422_p5)   ;;  %v1656_v9 = vld [vmem:[%s2114_s4 + $0x38] sm:$0xff] (!%p1422_p5)  }
  0x12   : > { %s1463_s10 = sshll.u32 %s308_s25, 6  ;;  %1514 = vmatprep.subr.bf16.mxu0 (!%p1422_p5), %v1650_v1  ;;  %1609 = vmatprep.subr.bf16.mxu1 (!%p1422_p5), %v1650_v1  ;;  %v1653_v6 = vld [vmem:[%s2114_s4 + $0x20] sm:$0xff] (!%p1422_p5)   ;;  %v1659_v10 = vld [vmem:[%s2112_s2 + $0x8] sm:$0xff] (!%p1422_p5)   ;;  %v1661_v12 = vld [vmem:[%s2112_s2 + $0x10] sm:$0xff] (!%p1422_p5)  }
  0x13   : > { %s1842_s13 = scalar_lea.vmem %s2113_s3, %s1463_s10  ;;  %1528 = vmatprep.mubr.bf16.mxu0 (!%p1422_p5), %v1657_v4  ;;  %1536 = vmatprep.mubr.bf16.mxu1 (!%p1422_p5), %v1658_v5  ;;  %v1660_v11 = vld [vmem:[%s2112_s2 + $0x28] sm:$0xff] (!%p1422_p5)   ;;  %v1662_v13 = vld [vmem:[%s2112_s2 + $0x30] sm:$0xff] (!%p1422_p5)   ;;  %v1663_v14 = vld [vmem:[%s2112_s2 + $0x18] sm:$0xff] (!%p1422_p5)  }
  0x14   : > { %v1664_v15 = vld [vmem:[%s2112_s2 + $0x38] sm:$0xff] (!%p1422_p5)   ;;  %v1423_v16 = vld [vmem:[%s2115_s5] ss:$0 sm:$0xff] (!%p1422_p5) }
  0x15   : > { %1515 = vmatpush3.bf16.msra.mxu0 (!%p1422_p5), %v1650_v1  ;;  %1617 = vmatpush3.bf16.msra.mxu1 (!%p1422_p5), %v1650_v1 }
  0x16   : > { %1516 = vmatprep.subr.bf16.mxu0 %v1651_v2  ;;  %1610 = vmatprep.subr.bf16.mxu1 %v1651_v2 }
  0x19   : > { %1517 = vmatpush3.bf16.msra.mxu0 %v1651_v2  ;;  %1618 = vmatpush3.bf16.msra.mxu1 %v1651_v2 }
  0x1a   : > { %1518 = vmatprep.subr.bf16.mxu0 %v1652_v3  ;;  %1611 = vmatprep.subr.bf16.mxu1 %v1652_v3 }
  0x1d   : > { %1519 = vmatpush3.bf16.msra.mxu0 %v1652_v3  ;;  %1619 = vmatpush3.bf16.msra.mxu1 %v1652_v3 }
  0x1e   : > { %1520 = vmatprep.subr.bf16.mxu0 %v1653_v6  ;;  %1612 = vmatprep.subr.bf16.mxu1 %v1653_v6 }
  0x21   : > { %1521 = vmatpush3.bf16.msra.mxu0 %v1653_v6  ;;  %1620 = vmatpush3.bf16.msra.mxu1 %v1653_v6 }
  0x22   : > { %1522 = vmatprep.subr.bf16.mxu0 %v1654_v7  ;;  %1613 = vmatprep.subr.bf16.mxu1 %v1654_v7 }
  0x25   : > { %1523 = vmatpush3.bf16.msra.mxu0 %v1654_v7  ;;  %1621 = vmatpush3.bf16.msra.mxu1 %v1654_v7 }
  0x26   : > { %1524 = vmatprep.subr.bf16.mxu0 %v1655_v8  ;;  %1614 = vmatprep.subr.bf16.mxu1 %v1655_v8 }
  0x29   : > { %1525 = vmatpush3.bf16.msra.mxu0 %v1655_v8  ;;  %1622 = vmatpush3.bf16.msra.mxu1 %v1655_v8 }
  0x2a   : > { %1526 = vmatprep.subr.bf16.mxu0 %v1656_v9  ;;  %1615 = vmatprep.subr.bf16.mxu1 %v1656_v9 }
  0x2d   : > { %1527 = vmatpush3.bf16.msra.mxu0 %v1656_v9  ;;  %1623 = vmatpush3.bf16.msra.mxu1 %v1656_v9 }
  0x30   : > { %1529 = vmatmul.mubr.bf16.vlgmr.msra.gmra.mrb[0].mxu0 %v1659_v10  ;;  %1537 = vmatmul.mubr.bf16.vlgmr.msra.gmra.mrb[0].mxu1 %v1660_v11 }
  0x31   : > { %1532 = vmatprep.mubr.bf16.mxu0 %v1661_v12  ;;  %1540 = vmatprep.mubr.bf16.mxu1 %v1662_v13 }
  0x38   : > { %1533 = vmatmul.mubr.bf16.gmra.mrb[4].mxu0 %v1663_v14  ;;  %1541 = vmatmul.mubr.bf16.gmra.mrb[4].mxu1 %v1664_v15 }
 0x103   : > { %v1530_v17 = vpop.f32.mrb[0].mxu0  ;;  %v1538_v18 = vpop.f32.mrb[0].mxu1 }
 0x104   : > { %v525_v19 = vadd.f32 %v1530_v17, %v1423_v16  ;;  %v557_v20 = vadd.f32 %v1538_v18, %v1423_v16  ;;  %v516_v21 = vpop.f32.mrb[1].mxu0  ;;  %v548_v22 = vpop.f32.mrb[1].mxu1 }
 0x105   : > { %v517_v23 = vadd.f32 %v1423_v16, %v516_v21  ;;  %v549_v24 = vadd.f32 %v1423_v16, %v548_v22  ;;  %v1531_v25 = vpop.f32.mrb[2].mxu0  ;;  %v1539_v26 = vpop.f32.mrb[2].mxu1 }
 0x106   : > { %581 = vst [vmem:[#allocation2 + $0x10] sm:$0xff] %v525_v19  ;;  %589 = vst [vmem:[#allocation2 + $0x50] sm:$0xff] %v557_v20  ;;  %v528_v27 = vadd.f32 %v1531_v25, %v1423_v16  ;;  %v560_v28 = vadd.f32 %v1539_v26, %v1423_v16  ;;  %v519_v29 = vpop.f32.mrb[3].mxu0  ;;  %v551_v30 = vpop.f32.mrb[3].mxu1 }
 0x107   : > { %579 = vst [vmem:[#allocation2] sm:$0xff] %v517_v23  ;;  %587 = vst [vmem:[#allocation2 + $0x40] sm:$0xff] %v549_v24  ;;  %v520_v31 = vadd.f32 %v1423_v16, %v519_v29  ;;  %v552_v32 = vadd.f32 %v1423_v16, %v551_v30 }
 0x108   : > { %582 = vst [vmem:[#allocation2 + $0x18] sm:$0xff] %v528_v27  ;;  %590 = vst [vmem:[#allocation2 + $0x58] sm:$0xff] %v560_v28 }
 0x109   : > { %580 = vst [vmem:[#allocation2 + $0x8] sm:$0xff] %v520_v31  ;;  %588 = vst [vmem:[#allocation2 + $0x48] sm:$0xff] %v552_v32 }
 0x10b   : > { %v1534_v33 = vpop.f32.mrb[4].mxu0  ;;  %v1542_v34 = vpop.f32.mrb[4].mxu1 }
 0x10c   : > { %v541_v35 = vadd.f32 %v1534_v33, %v1423_v16  ;;  %v573_v36 = vadd.f32 %v1542_v34, %v1423_v16  ;;  %v532_v37 = vpop.f32.mrb[5].mxu0  ;;  %v564_v38 = vpop.f32.mrb[5].mxu1 }
 0x10d   : > { %v533_v39 = vadd.f32 %v1423_v16, %v532_v37  ;;  %v565_v40 = vadd.f32 %v1423_v16, %v564_v38  ;;  %v1535_v41 = vpop.f32.mrb[6].mxu0  ;;  %v1543_v42 = vpop.f32.mrb[6].mxu1 }
 0x10e   : > { %585 = vst [vmem:[#allocation2 + $0x30] sm:$0xff] %v541_v35  ;;  %593 = vst [vmem:[#allocation2 + $0x70] sm:$0xff] %v573_v36  ;;  %v544_v43 = vadd.f32 %v1535_v41, %v1423_v16  ;;  %v576_v44 = vadd.f32 %v1543_v42, %v1423_v16  ;;  %v535_v45 = vpop.f32.mrb[7].mxu0  ;;  %v567_v46 = vpop.f32.mrb[7].mxu1 }
 0x10f   : > { %583 = vst [vmem:[#allocation2 + $0x20] sm:$0xff] %v533_v39  ;;  %591 = vst [vmem:[#allocation2 + $0x60] sm:$0xff] %v565_v40  ;;  %v536_v47 = vadd.f32 %v1423_v16, %v535_v45  ;;  %v568_v48 = vadd.f32 %v1423_v16, %v567_v46 }
 0x110   : > { %586 = vst [vmem:[#allocation2 + $0x38] sm:$0xff] %v544_v43  ;;  %594 = vst [vmem:[#allocation2 + $0x78] sm:$0xff] %v576_v44 }
 0x111   : > { %584 = vst [vmem:[#allocation2 + $0x28] sm:$0xff] %v536_v47  ;;  %592 = vst [vmem:[#allocation2 + $0x68] sm:$0xff] %v568_v48 }
 0x112 PF: > { %v1667_v49 = vld [vmem:[%s2112_s2] sm:$0xff]   ;;  %v1668_v50 = vld [vmem:[%s2112_s2 + $0x8] sm:$0xff]   ;;  %v1669_v51 = vld [vmem:[%s2112_s2 + $0x10] sm:$0xff]   ;;  %v1771_v15 = vmov 0   ;;  %p1456_p6 = scmp.ne.s32.totalorder %s1761_s21, 2 }
 0x113   : > { %1544 = vmatprep.subr.bf16.mxu0 %v1667_v49  ;;  %v1670_v52 = vld [vmem:[%s2112_s2 + $0x18] sm:$0xff]   ;;  %v595_v53 = vld [vmem:[%s1832_s30] sm:$0xff]  ;;  %v1676_v56 = vld [vmem:[%s1842_s13 + $0x8] sm:$0xff]   ;;  %1666 = vset.pattern.permute.xlu1 %v1771_v15 }
 0x114   : > { %1545 = vmatpush3.bf16.msra.mxu0 %v1667_v49  ;;  %v599_v54 = vunpack.c.l.s8.bf16 %v595_v53  ;;  %v1675_v55 = vld [vmem:[%s1842_s13] sm:$0xff]   ;;  %v1677_v58 = vld [vmem:[%s1842_s13 + $0x10] sm:$0xff]   ;;  %v1672_v59 = vld [vmem:[%s2112_s2 + $0x28] sm:$0xff]   ;;  %v600_v2 = vunpack.c.h.s8.bf16 %v595_v53  ;;  %1665 = vset.pattern.permute.xlu0 %v1771_v15 }
 0x115   : > { %1546 = vmatprep.subr.bf16.mxu0 %v1668_v50  ;;  %v1671_v57 = vld [vmem:[%s2112_s2 + $0x20] sm:$0xff]   ;;  %1576 = vmatprep.subr.bf16.mxu1 %v1675_v55  ;;  %v1678_v60 = vld [vmem:[%s1842_s13 + $0x18] sm:$0xff]   ;;  %v1673_v61 = vld [vmem:[%s2112_s2 + $0x30] sm:$0xff]  }
 0x116   : > { %1560 = vmatprep.mubr.bf16.mxu0 %v599_v54  ;;  %1577 = vmatpush3.bf16.msra.mxu1 %v1675_v55  ;;  %v1679_v62 = vld [vmem:[%s1842_s13 + $0x20] sm:$0xff]   ;;  %v1674_v63 = vld [vmem:[%s2112_s2 + $0x38] sm:$0xff]   ;;  %v1680_v0 = vld [vmem:[%s1842_s13 + $0x28] sm:$0xff]  }
 0x117   : > { %1578 = vmatprep.subr.bf16.mxu1 %v1676_v56  ;;  %v596_v1 = vld [vmem:[%s1832_s30 + $0x8] sm:$0xff]  ;;  %v1681_v3 = vld [vmem:[%s1842_s13 + $0x30] sm:$0xff]   ;;  %v598_v8 = vld [vmem:[%s1832_s30 + $0x18] sm:$0xff] }
 0x118   : > { %1547 = vmatpush3.bf16.msra.mxu0 %v1668_v50  ;;  %v601_v4 = vunpack.c.l.s8.bf16 %v596_v1  ;;  %v597_v5 = vld [vmem:[%s1832_s30 + $0x10] sm:$0xff]  ;;  %v602_v6 = vunpack.c.h.s8.bf16 %v596_v1  ;;  %v605_v10 = vunpack.c.l.s8.bf16 %v598_v8  ;;  %v606_v11 = vunpack.c.h.s8.bf16 %v598_v8  ;;  %v1682_v12 = vld [vmem:[%s1842_s13 + $0x38] sm:$0xff]   ;;  %v953_v14 = vld [vmem:[%s1837_s9] sm:$0xff] }
 0x119   : > { %1548 = vmatprep.subr.bf16.mxu0 %v1669_v51  ;;  %v603_v7 = vunpack.c.l.s8.bf16 %v597_v5  ;;  %v604_v9 = vunpack.c.h.s8.bf16 %v597_v5  ;;  %v955_v13 = vld [vmem:[%s1837_s9 + $0x10] sm:$0xff]  ;;  %971 = vperm.xlu0 %1665, %v953_v14   ;;  %v956_v16 = vld [vmem:[%s1837_s9 + $0x18] sm:$0xff]  ;;  %v954_v17 = vld [vmem:[%s1837_s9 + $0x8] sm:$0xff] }
 0x11a   : > { %1579 = vmatpush3.bf16.msra.mxu1 %v1676_v56  ;;  %981 = vperm.xlu1 %1666, %v955_v13   ;;  %v958_v18 = vld [vmem:[%s1837_s9 + $0x28] sm:$0xff]  ;;  %v957_v19 = vld [vmem:[%s1837_s9 + $0x20] sm:$0xff]  ;;  %v960_v20 = vld [vmem:[%s1837_s9 + $0x38] sm:$0xff] }
 0x11b   : > { %1580 = vmatprep.subr.bf16.mxu1 %v1677_v58  ;;  %v959_v21 = vld [vmem:[%s1837_s9 + $0x30] sm:$0xff]  ;;  %v962_v22 = vld [vmem:[%s1837_s9 + $0x48] sm:$0xff]  ;;  %v961_v23 = vld [vmem:[%s1837_s9 + $0x40] sm:$0xff] }
 0x11c   : > { %1549 = vmatpush3.bf16.msra.mxu0 %v1669_v51  ;;  %v964_v24 = vld [vmem:[%s1837_s9 + $0x58] sm:$0xff]  ;;  %v963_v25 = vld [vmem:[%s1837_s9 + $0x50] sm:$0xff]  ;;  %v966_v26 = vld [vmem:[%s1837_s9 + $0x68] sm:$0xff] }
 0x11d   : > { %1550 = vmatprep.subr.bf16.mxu0 %v1670_v52  ;;  %976 = vperm.xlu0 %1665, %v954_v17   ;;  %v965_v27 = vld [vmem:[%s1837_s9 + $0x60] sm:$0xff]  ;;  %v968_v28 = vld [vmem:[%s1837_s9 + $0x78] sm:$0xff]  ;;  %v967_v29 = vld [vmem:[%s1837_s9 + $0x70] sm:$0xff] }
 0x11e   : > { %1581 = vmatpush3.bf16.msra.mxu1 %v1677_v58  ;;  %986 = vperm.xlu1 %1666, %v956_v16   ;;  %v937_v1 = vld [vmem:[#allocation2] sm:$0xff]  ;;  %v940_v5 = vld [vmem:[#allocation2 + $0x18] sm:$0xff]  ;;  %v943_v17 = vld [vmem:[#allocation2 + $0x30] sm:$0xff] }
 0x11f   : > { %1582 = vmatprep.subr.bf16.mxu1 %v1678_v60 }
 0x120   : > { %1551 = vmatpush3.bf16.msra.mxu0 %v1670_v52 }
 0x121   : > { %1552 = vmatprep.subr.bf16.mxu0 %v1671_v57  ;;  %991 = vperm.xlu0 %1665, %v957_v19  }
 0x122   : > { %1583 = vmatpush3.bf16.msra.mxu1 %v1678_v60  ;;  %996 = vperm.xlu1 %1666, %v958_v18  }
 0x123   : > { %1584 = vmatprep.subr.bf16.mxu1 %v1679_v62 }
 0x124   : > { %1553 = vmatpush3.bf16.msra.mxu0 %v1671_v57 }
 0x125   : > { %1554 = vmatprep.subr.bf16.mxu0 %v1672_v59  ;;  %1001 = vperm.xlu0 %1665, %v959_v21  }
 0x126   : > { %1585 = vmatpush3.bf16.msra.mxu1 %v1679_v62  ;;  %1006 = vperm.xlu1 %1666, %v960_v20   ;;  %v939_v62 = vld [vmem:[#allocation2 + $0x10] sm:$0xff]  ;;  %v941_v20 = vld [vmem:[#allocation2 + $0x20] sm:$0xff] }
 0x127   : > { %1586 = vmatprep.subr.bf16.mxu1 %v1680_v0 }
 0x128   : > { %1555 = vmatpush3.bf16.msra.mxu0 %v1672_v59 }
 0x129   : > { %1556 = vmatprep.subr.bf16.mxu0 %v1673_v61  ;;  %1011 = vperm.xlu0 %1665, %v961_v23   ;;  %v944_v23 = vld [vmem:[#allocation2 + $0x38] sm:$0xff] }
 0x12a   : > { %1587 = vmatpush3.bf16.msra.mxu1 %v1680_v0  ;;  %1016 = vperm.xlu1 %1666, %v962_v22  }
 0x12b   : > { %1588 = vmatprep.subr.bf16.mxu1 %v1681_v3 }
 0x12c   : > { %1557 = vmatpush3.bf16.msra.mxu0 %v1673_v61 }
 0x12d   : > { %1558 = vmatprep.subr.bf16.mxu0 %v1674_v63  ;;  %1021 = vperm.xlu0 %1665, %v963_v25  }
 0x12e   : > { %1589 = vmatpush3.bf16.msra.mxu1 %v1681_v3  ;;  %1026 = vperm.xlu1 %1666, %v964_v24  }
 0x12f   : > { %1590 = vmatprep.subr.bf16.mxu1 %v1682_v12 }
 0x130   : > { %1559 = vmatpush3.bf16.msra.mxu0 %v1674_v63 }
 0x131   : > { %1031 = vperm.xlu0 %1665, %v965_v27   ;;  %v942_v27 = vld [vmem:[#allocation2 + $0x28] sm:$0xff] }
 0x132   : > { %1591 = vmatpush3.bf16.msra.mxu1 %v1682_v12  ;;  %1036 = vperm.xlu1 %1666, %v966_v26  }
 0x133   : > { %1561 = vmatmul.mubr.bf16.vlgmr.msra.gmra.mrb[0].mxu0 %v600_v2 }
 0x134   : > { %1564 = vmatprep.mubr.bf16.mxu0 %v601_v4 }
 0x135   : > { %1041 = vperm.xlu0 %1665, %v967_v29  }
 0x136   : > { %1046 = vperm.xlu1 %1666, %v968_v28  }
 0x13b   : > { %1565 = vmatmul.mubr.bf16.gmra.mrb[4].mxu0 %v602_v6 }
 0x13c   : > { %1568 = vmatprep.mubr.bf16.mxu0 %v603_v7 }
 0x143   : > { %1569 = vmatmul.mubr.bf16.gmra.mrb[8].mxu0 %v604_v9  ;;  %v938_v9 = vld [vmem:[#allocation2 + $0x8] sm:$0xff] }
 0x144   : > { %1572 = vmatprep.mubr.bf16.mxu0 %v605_v10 }
 0x14b   : > { %1573 = vmatmul.mubr.bf16.gmra.mrb[12].mxu0 %v606_v11 }
 0x198   : > { %v972_v54 = vpop.permute.xlu0 %971 }
 0x199   : > { %v982_v55 = vpop.permute.xlu1 %981 }
 0x19c   : > { %v977_v56 = vpop.permute.xlu0 %976 }
 0x19d   : > { %v987_v57 = vpop.permute.xlu1 %986 }
 0x1a0   : > { %v992_v58 = vpop.permute.xlu0 %991 }
 0x1a1   : > { %v997_v59 = vpop.permute.xlu1 %996 }
 0x1a4   : > { %v1002_v60 = vpop.permute.xlu0 %1001 }
 0x1a5   : > { %v1007_v2 = vpop.permute.xlu1 %1006 }
 0x1a8   : > { %v1012_v13 = vpop.permute.xlu0 %1011 }
 0x1a9   : > { %v1017_v15 = vpop.permute.xlu1 %1016 }
 0x1ac   : > { %v1022_v28 = vpop.permute.xlu0 %1021 }
 0x206   : > { %v1562_v30 = vpop.f32.mrb[0].mxu0 }
 0x207   : > { %v705_v31 = vpop.f32.mrb[1].mxu0 }
 0x208   : > { %v1563_v32 = vpop.f32.mrb[2].mxu0 }
 0x209   : > { %v769_v33 = vpack.c.bf16 %v1563_v32, %v1562_v30  ;;  %v708_v34 = vpop.f32.mrb[3].mxu0  ;;  %v1027_v32 = vpop.permute.xlu1 %1026 }
 0x20a   : > { %v768_v35 = vpack.c.bf16 %v708_v34, %v705_v31 }
 0x20c   : > { %1592 = vmatprep.mubr.bf16.mxu1 %v768_v35  ;;  %v947_v35 = vld [vmem:[#allocation2 + $0x50] sm:$0xff] }
 0x20d   : > { %1593 = vmatmul.mubr.bf16.vlgmr.msra.gmra.mrb[0].mxu1 %v769_v33 }
 0x20e   : > { %v1566_v36 = vpop.f32.mrb[4].mxu0 }
 0x20f   : > { %v721_v37 = vpop.f32.mrb[5].mxu0 }
 0x210   : > { %v1567_v38 = vpop.f32.mrb[6].mxu0 }
 0x211   : > { %v771_v39 = vpack.c.bf16 %v1567_v38, %v1566_v36  ;;  %v724_v40 = vpop.f32.mrb[7].mxu0  ;;  %v945_v38 = vld [vmem:[#allocation2 + $0x40] sm:$0xff] }
 0x212   : > { %v770_v41 = vpack.c.bf16 %v724_v40, %v721_v37 }
 0x214   : > { %1596 = vmatprep.mubr.bf16.mxu1 %v770_v41 }
 0x215   : > { %1597 = vmatmul.mubr.bf16.gmra.mrb[4].mxu1 %v771_v39  ;;  %v1032_v39 = vpop.permute.xlu0 %1031 }
 0x216   : > { %v1570_v42 = vpop.f32.mrb[8].mxu0 }
 0x217   : > { %v737_v43 = vpop.f32.mrb[9].mxu0 }
 0x218   : > { %v1571_v44 = vpop.f32.mrb[10].mxu0 }
 0x219   : > { %v773_v45 = vpack.c.bf16 %v1571_v44, %v1570_v42  ;;  %v740_v46 = vpop.f32.mrb[11].mxu0  ;;  %v948_v42 = vld [vmem:[#allocation2 + $0x58] sm:$0xff] }
 0x21a   : > { %v772_v47 = vpack.c.bf16 %v740_v46, %v737_v43  ;;  %v946_v46 = vld [vmem:[#allocation2 + $0x48] sm:$0xff] }
 0x21c   : > { %1600 = vmatprep.mubr.bf16.mxu1 %v772_v47  ;;  %v1037_v47 = vpop.permute.xlu1 %1036 }
 0x21d   : > { %1601 = vmatmul.mubr.bf16.gmra.mrb[8].mxu1 %v773_v45 }
 0x21e   : > { %v1574_v48 = vpop.f32.mrb[12].mxu0 }
 0x21f   : > { %v753_v49 = vpop.f32.mrb[13].mxu0 }
 0x220   : > { %v1575_v50 = vpop.f32.mrb[14].mxu0 }
 0x221   : > { %v775_v51 = vpack.c.bf16 %v1575_v50, %v1574_v48  ;;  %v756_v52 = vpop.f32.mrb[15].mxu0 }
 0x222   : > { %v774_v53 = vpack.c.bf16 %v756_v52, %v753_v49  ;;  %v1042_v52 = vpop.permute.xlu0 %1041 }
 0x224   : > { %1604 = vmatprep.mubr.bf16.mxu1 %v774_v53 }
 0x225   : > { %1605 = vmatmul.mubr.bf16.gmra.mrb[12].mxu1 %v775_v51 }
 0x2e0   : > { %v1594_v61 = vpop.f32.mrb[0].mxu1 }
 0x2e1   : > { %v1051_v63 = vmul.f32 %v1594_v61, %v982_v55  ;;  %v874_v0 = vpop.f32.mrb[1].mxu1  ;;  %v952_v61 = vld [vmem:[#allocation2 + $0x78] sm:$0xff] }
 0x2e2   : > { %v1049_v3 = vmul.f32 %v972_v54, %v874_v0  ;;  %v1595_v4 = vpop.f32.mrb[2].mxu1  ;;  %v951_v54 = vld [vmem:[#allocation2 + $0x70] sm:$0xff] }
 0x2e3   : > { %v1067_v6 = vadd.f32 %v1051_v63, %v939_v62  ;;  %v1052_v7 = vmul.f32 %v1595_v4, %v987_v57  ;;  %v877_v8 = vpop.f32.mrb[3].mxu1  ;;  %v949_v57 = vld [vmem:[#allocation2 + $0x60] sm:$0xff] }
 0x2e4   : > { %v1065_v10 = vadd.f32 %v1049_v3, %v937_v1  ;;  %v1050_v11 = vmul.f32 %v977_v56, %v877_v8  ;;  %v950_v1 = vld [vmem:[#allocation2 + $0x68] sm:$0xff] }
 0x2e5   : > { %1083 = vst [vmem:[#allocation2 + $0x10] sm:$0xff] %v1067_v6  ;;  %v1068_v12 = vadd.f32 %v1052_v7, %v940_v5  ;;  %v1117_v6 = vlaneseq (!%p1456_p6) }
 0x2e6   : > { %1081 = vst [vmem:[#allocation2] sm:$0xff] %v1065_v10  ;;  %v1066_v14 = vadd.f32 %v1050_v11, %v938_v9 }
 0x2e7   : > { %1084 = vst [vmem:[#allocation2 + $0x18] sm:$0xff] %v1068_v12  ;;  %v1118_v8 = vand.u32 (!%p1456_p6), 127, %v1117_v6 }
 0x2e8   : > { %1082 = vst [vmem:[#allocation2 + $0x8] sm:$0xff] %v1066_v14  ;;  %v1598_v16 = vpop.f32.mrb[4].mxu1 }
 0x2e9   : > { %v1055_v18 = vmul.f32 %v1598_v16, %v1002_v60  ;;  %v890_v19 = vpop.f32.mrb[5].mxu1  ;;  %vm1119_vm0 = vcmp.lt.s32.totalorder (!%p1456_p6), %v1118_v8, 4 }
 0x2ea   : > { %v1053_v21 = vmul.f32 %v992_v58, %v890_v19  ;;  %v1599_v22 = vpop.f32.mrb[6].mxu1  ;;  %v1047_v58 = vpop.permute.xlu1 %1046 }
 0x2eb   : > { %v1071_v24 = vadd.f32 %v1055_v18, %v943_v17  ;;  %v1056_v25 = vmul.f32 %v1599_v22, %v1007_v2  ;;  %v893_v26 = vpop.f32.mrb[7].mxu1 }
 0x2ec   : > { %v1069_v29 = vadd.f32 %v1053_v21, %v941_v20  ;;  %v1054_v30 = vmul.f32 %v997_v59, %v893_v26  ;;  %v1103_v9 = vld [vmem:[#allocation2 + $0x10] sm:$0xff] (!%p1456_p6) }
 0x2ed   : > { %1087 = vst [vmem:[#allocation2 + $0x30] sm:$0xff] %v1071_v24  ;;  %v1072_v31 = vadd.f32 %v1056_v25, %v944_v23  ;;  %v1101_v7 = vld [vmem:[#allocation2] sm:$0xff] (!%p1456_p6) }
 0x2ee   : > { %1085 = vst [vmem:[#allocation2 + $0x20] sm:$0xff] %v1069_v29  ;;  %v1070_v33 = vadd.f32 %v1054_v30, %v942_v27  ;;  %v1104_v11 = vld [vmem:[#allocation2 + $0x18] sm:$0xff] (!%p1456_p6)  ;;  %v1120_v12 = vsel (!%p1456_p6), %vm1119_vm0, %v1101_v7, -1e+30 }
 0x2ef   : > { %1088 = vst [vmem:[#allocation2 + $0x38] sm:$0xff] %v1072_v31  ;;  %v1102_v10 = vld [vmem:[#allocation2 + $0x8] sm:$0xff] (!%p1456_p6)  ;;  %1136 = vmax.xlane.f32.xlu0 (!%p1456_p6), %v1120_v12 }
 0x2f0   : > { %1086 = vst [vmem:[#allocation2 + $0x28] sm:$0xff] %v1070_v33  ;;  %v1602_v34 = vpop.f32.mrb[8].mxu1  ;;  %v1121_v14 = vsel (!%p1456_p6), %vm1119_vm0, %v1102_v10, -1e+30 }
 0x2f1   : > { %v1059_v36 = vmul.f32 %v1602_v34, %v1022_v28  ;;  %v906_v37 = vpop.f32.mrb[9].mxu1 }
 0x2f2   : > { %v1057_v40 = vmul.f32 %v1012_v13, %v906_v37  ;;  %v1603_v41 = vpop.f32.mrb[10].mxu1  ;;  %v1122_v13 = vsel (!%p1456_p6), %vm1119_vm0, %v1103_v9, -1e+30 }
 0x2f3   : > { %v1075_v43 = vadd.f32 %v1059_v36, %v947_v35  ;;  %v1060_v44 = vmul.f32 %v1603_v41, %v1027_v32  ;;  %v909_v45 = vpop.f32.mrb[11].mxu1  ;;  %1140 = vmax.xlane.f32.xlu1 (!%p1456_p6), %v1122_v13  ;;  %1138 = vmax.xlane.f32.xlu0 (!%p1456_p6), %v1121_v14 }
 0x2f4   : > { %v1073_v48 = vadd.f32 %v1057_v40, %v945_v38  ;;  %v1058_v49 = vmul.f32 %v1017_v15, %v909_v45  ;;  %v1123_v15 = vsel (!%p1456_p6), %vm1119_vm0, %v1104_v11, -1e+30  ;;  %v1107_v20 = vld [vmem:[#allocation2 + $0x30] sm:$0xff] (!%p1456_p6) }
 0x2f5   : > { %1091 = vst [vmem:[#allocation2 + $0x50] sm:$0xff] %v1075_v43  ;;  %v1076_v50 = vadd.f32 %v1060_v44, %v948_v42  ;;  %v1105_v16 = vld [vmem:[#allocation2 + $0x20] sm:$0xff] (!%p1456_p6)  ;;  %v1126_v22 = vsel (!%p1456_p6), %vm1119_vm0, %v1107_v20, -1e+30 }
 0x2f6   : > { %1089 = vst [vmem:[#allocation2 + $0x40] sm:$0xff] %v1073_v48  ;;  %v1074_v51 = vadd.f32 %v1058_v49, %v946_v46  ;;  %v1124_v18 = vsel (!%p1456_p6), %vm1119_vm0, %v1105_v16, -1e+30  ;;  %v1108_v21 = vld [vmem:[#allocation2 + $0x38] sm:$0xff] (!%p1456_p6) }
 0x2f7   : > { %1092 = vst [vmem:[#allocation2 + $0x58] sm:$0xff] %v1076_v50  ;;  %v1106_v17 = vld [vmem:[#allocation2 + $0x28] sm:$0xff] (!%p1456_p6)  ;;  %1142 = vmax.xlane.f32.xlu1 (!%p1456_p6), %v1123_v15  ;;  %1144 = vmax.xlane.f32.xlu0 (!%p1456_p6), %v1124_v18  ;;  %v1127_v23 = vsel (!%p1456_p6), %vm1119_vm0, %v1108_v21, -1e+30 }
 0x2f8   : > { %1090 = vst [vmem:[#allocation2 + $0x48] sm:$0xff] %v1074_v51  ;;  %v1606_v53 = vpop.f32.mrb[12].mxu1  ;;  %v1125_v19 = vsel (!%p1456_p6), %vm1119_vm0, %v1106_v17, -1e+30 }
 0x2f9   : > { %v1063_v55 = vmul.f32 %v1606_v53, %v1042_v52  ;;  %v922_v56 = vpop.f32.mrb[13].mxu1 }
 0x2fa   : > { %v1061_v59 = vmul.f32 %v1032_v39, %v922_v56  ;;  %v1607_v60 = vpop.f32.mrb[14].mxu1  ;;  %1100 = sbr.rel (%p1456_p6) target bundleno = 1099 (0x44b), region = 52 }
 0x2fb   : > { %v1079_v62 = vadd.f32 %v1063_v55, %v951_v54  ;;  %v1064_v63 = vmul.f32 %v1607_v60, %v1047_v58  ;;  %v925_v0 = vpop.f32.mrb[15].mxu1  ;;  %1146 = vmax.xlane.f32.xlu1 (!%p1456_p6), %v1125_v19  ;;  %1148 = vmax.xlane.f32.xlu0 (!%p1456_p6), %v1126_v22 }
 0x2fc   : > { %v1077_v2 = vadd.f32 %v1061_v59, %v949_v57  ;;  %v1062_v3 = vmul.f32 %v1037_v47, %v925_v0  ;;  %v1111_v28 = vld [vmem:[#allocation2 + $0x50] sm:$0xff] (!%p1456_p6) }
 0x2fd   : > { %1095 = vst [vmem:[#allocation2 + $0x70] sm:$0xff] %v1079_v62  ;;  %v1080_v4 = vadd.f32 %v1064_v63, %v952_v61  ;;  %v1109_v24 = vld [vmem:[#allocation2 + $0x40] sm:$0xff] (!%p1456_p6)  ;;  %v1960_v30 = vsel (!%p1456_p6), %vm1119_vm0, %v1111_v28, -1e+30 }
 0x2fe   : > { %1093 = vst [vmem:[#allocation2 + $0x60] sm:$0xff] %v1077_v2  ;;  %v1078_v5 = vadd.f32 %v1062_v3, %v950_v1  ;;  %v1128_v26 = vsel (!%p1456_p6), %vm1119_vm0, %v1109_v24, -1e+30  ;;  %v1112_v29 = vld [vmem:[#allocation2 + $0x58] sm:$0xff] (!%p1456_p6) }
 0x2ff   : > { %1096 = vst [vmem:[#allocation2 + $0x78] sm:$0xff] %v1080_v4  ;;  %v1110_v25 = vld [vmem:[#allocation2 + $0x48] sm:$0xff] (!%p1456_p6)  ;;  %1150 = vmax.xlane.f32.xlu1 (!%p1456_p6), %v1127_v23  ;;  %1152 = vmax.xlane.f32.xlu0 (!%p1456_p6), %v1128_v26  ;;  %v1963_v31 = vsel (!%p1456_p6), %vm1119_vm0, %v1112_v29, -1e+30 }
 0x300   : > { %1094 = vst [vmem:[#allocation2 + $0x68] sm:$0xff] %v1078_v5  ;;  %v1129_v27 = vsel (!%p1456_p6), %vm1119_vm0, %v1110_v25, -1e+30 }
 0x303   : > { %1154 = vmax.xlane.f32.xlu1 %v1129_v27  ;;  %1156 = vmax.xlane.f32.xlu0 %v1960_v30 }
 0x304   : > { %v1115_v36 = vld [vmem:[#allocation2 + $0x70] sm:$0xff] }
 0x305   : > { %v1113_v32 = vld [vmem:[#allocation2 + $0x60] sm:$0xff]  ;;  %v1976_v38 = vsel %vm1119_vm0, %v1115_v36, -1e+30 }
 0x306   : > { %v1968_v34 = vsel %vm1119_vm0, %v1113_v32, -1e+30  ;;  %v1116_v37 = vld [vmem:[#allocation2 + $0x78] sm:$0xff] }
 0x307   : > { %v1114_v33 = vld [vmem:[#allocation2 + $0x68] sm:$0xff]  ;;  %1158 = vmax.xlane.f32.xlu1 %v1963_v31  ;;  %1160 = vmax.xlane.f32.xlu0 %v1968_v34  ;;  %v1979_v39 = vsel %vm1119_vm0, %v1116_v37, -1e+30 }
 0x308   : > { %v1971_v35 = vsel %vm1119_vm0, %v1114_v33, -1e+30 }
 0x30b   : > { %1162 = vmax.xlane.f32.xlu1 %v1971_v35  ;;  %1164 = vmax.xlane.f32.xlu0 %v1976_v38 }
 0x30f   : > { %1166 = vmax.xlane.f32.xlu1 %v1979_v39 }
 0x37c   : > { %v1137_v40 = vpop.xlane.xlu0 %1136 }
 0x37d   : > { %v1983_v42 = vsub.f32 %v1120_v12, %v1137_v40 }
 0x37f   : > { %v1184_v44 = vmul.f32 1.442695, %v1983_v42 }
 0x380   : > { %v1141_v41 = vpop.xlane.xlu1 %1140  ;;  %v1139_v46 = vpop.xlane.xlu0 %1138 }
 0x381   : > { %v1985_v43 = vsub.f32 %v1122_v13, %v1141_v41  ;;  %1683 = vpow2.f32 %v1184_v44  ;;  %v1989_v48 = vsub.f32 %v1121_v14, %v1139_v46 }
 0x383   : > { %v1188_v45 = vmul.f32 1.442695, %v1985_v43  ;;  %v1186_v50 = vmul.f32 1.442695, %v1989_v48 }
 0x384   : > { %v1143_v47 = vpop.xlane.xlu1 %1142  ;;  %v1145_v52 = vpop.xlane.xlu0 %1144 }
 0x385   : > { %v1991_v49 = vsub.f32 %v1123_v15, %v1143_v47  ;;  %1685 = vpow2.f32 %v1188_v45  ;;  %v1995_v54 = vsub.f32 %v1124_v18, %v1145_v52 }
 0x386   : > { %1687 = vpow2.f32 %v1186_v50 }
 0x387   : > { %v1190_v51 = vmul.f32 1.442695, %v1991_v49  ;;  %v1192_v56 = vmul.f32 1.442695, %v1995_v54 }
 0x388   : > { %v1147_v53 = vpop.xlane.xlu1 %1146  ;;  %v1149_v58 = vpop.xlane.xlu0 %1148 }
 0x389   : > { %v1997_v55 = vsub.f32 %v1125_v19, %v1147_v53  ;;  %1689 = vpow2.f32 %v1190_v51  ;;  %v2001_v60 = vsub.f32 %v1126_v22, %v1149_v58 }
 0x38a   : > { %1691 = vpow2.f32 %v1192_v56 }
 0x38b   : > { %v1194_v57 = vmul.f32 1.442695, %v1997_v55  ;;  %v1684_v62 = vpop.eup %1683  ;;  %v1196_v63 = vmul.f32 1.442695, %v2001_v60 }
 0x38c   : > { %v1151_v59 = vpop.xlane.xlu1 %1150  ;;  %1216 = vadd.xlane.f32.xlu0 %v1684_v62  ;;  %v1153_v1 = vpop.xlane.xlu0 %1152 }
 0x38d   : > { %v2003_v61 = vsub.f32 %v1127_v23, %v1151_v59  ;;  %1693 = vpow2.f32 %v1194_v57  ;;  %v2007_v4 = vsub.f32 %v1128_v26, %v1153_v1 }
 0x38e   : > { %1695 = vpow2.f32 %v1196_v63 }
 0x38f   : > { %v1198_v0 = vmul.f32 1.442695, %v2003_v61  ;;  %v1686_v3 = vpop.eup %1685  ;;  %v1200_v7 = vmul.f32 1.442695, %v2007_v4 }
 0x390   : > { %v1155_v2 = vpop.xlane.xlu1 %1154  ;;  %v1688_v6 = vpop.eup %1687  ;;  %1220 = vadd.xlane.f32.xlu0 %v1686_v3 }
 0x391   : > { %v2009_v5 = vsub.f32 %v1129_v27, %v1155_v2  ;;  %1697 = vpow2.f32 %v1198_v0  ;;  %1218 = vadd.xlane.f32.xlu1 %v1688_v6  ;;  %v1157_v9 = vpop.xlane.xlu0 %1156 }
 0x392   : > { %1699 = vpow2.f32 %v1200_v7  ;;  %v2014_v12 = vsub.f32 %v1960_v30, %v1157_v9 }
 0x393   : > { %v1202_v8 = vmul.f32 1.442695, %v2009_v5  ;;  %v1690_v11 = vpop.eup %1689 }
 0x394   : > { %v1159_v10 = vpop.xlane.xlu1 %1158  ;;  %v1692_v14 = vpop.eup %1691  ;;  %v1204_v15 = vmul.f32 1.442695, %v2014_v12 }
 0x395   : > { %v2017_v13 = vsub.f32 %v1963_v31, %v1159_v10  ;;  %1701 = vpow2.f32 %v1202_v8  ;;  %1222 = vadd.xlane.f32.xlu1 %v1690_v11  ;;  %1224 = vadd.xlane.f32.xlu0 %v1692_v14  ;;  %v1161_v17 = vpop.xlane.xlu0 %1160 }
 0x396   : > { %1703 = vpow2.f32 %v1204_v15  ;;  %v2022_v20 = vsub.f32 %v1968_v34, %v1161_v17 }
 0x397   : > { %v1206_v16 = vmul.f32 1.442695, %v2017_v13  ;;  %v1694_v19 = vpop.eup %1693 }
 0x398   : > { %v1163_v18 = vpop.xlane.xlu1 %1162  ;;  %v1696_v22 = vpop.eup %1695  ;;  %v1208_v23 = vmul.f32 1.442695, %v2022_v20 }
 0x399   : > { %v2025_v21 = vsub.f32 %v1971_v35, %v1163_v18  ;;  %1705 = vpow2.f32 %v1206_v16  ;;  %1226 = vadd.xlane.f32.xlu1 %v1694_v19  ;;  %1228 = vadd.xlane.f32.xlu0 %v1696_v22  ;;  %v1165_v25 = vpop.xlane.xlu0 %1164 }
 0x39a   : > { %1707 = vpow2.f32 %v1208_v23  ;;  %v2030_v28 = vsub.f32 %v1976_v38, %v1165_v25 }
 0x39b   : > { %v1210_v24 = vmul.f32 1.442695, %v2025_v21  ;;  %v1698_v27 = vpop.eup %1697 }
 0x39c   : > { %v1167_v26 = vpop.xlane.xlu1 %1166  ;;  %v1700_v30 = vpop.eup %1699  ;;  %v1212_v31 = vmul.f32 1.442695, %v2030_v28 }
 0x39d   : > { %v2033_v29 = vsub.f32 %v1979_v39, %v1167_v26  ;;  %1709 = vpow2.f32 %v1210_v24  ;;  %1230 = vadd.xlane.f32.xlu1 %v1698_v27  ;;  %1232 = vadd.xlane.f32.xlu0 %v1700_v30 }
 0x39e   : > { %1711 = vpow2.f32 %v1212_v31 }
 0x39f   : > { %v1214_v32 = vmul.f32 1.442695, %v2033_v29  ;;  %v1702_v33 = vpop.eup %1701 }
 0x3a0   : > { %v1704_v34 = vpop.eup %1703 }
 0x3a1   : > { %1713 = vpow2.f32 %v1214_v32  ;;  %1234 = vadd.xlane.f32.xlu1 %v1702_v33  ;;  %1236 = vadd.xlane.f32.xlu0 %v1704_v34 }
 0x3a3   : > { %v1706_v35 = vpop.eup %1705 }
 0x3a4   : > { %v1708_v36 = vpop.eup %1707 }
 0x3a5   : > { %1238 = vadd.xlane.f32.xlu1 %v1706_v35  ;;  %1240 = vadd.xlane.f32.xlu0 %v1708_v36 }
 0x3a7   : > { %v1710_v37 = vpop.eup %1709 }
 0x3a8   : > { %v1712_v38 = vpop.eup %1711 }
 0x3a9   : > { %1242 = vadd.xlane.f32.xlu1 %v1710_v37  ;;  %1244 = vadd.xlane.f32.xlu0 %v1712_v38 }
 0x3ab   : > { %v1714_v39 = vpop.eup %1713 }
 0x3ad   : > { %1246 = vadd.xlane.f32.xlu1 %v1714_v39 }
 0x419   : > { %v1217_v40 = vpop.xlane.xlu0 %1216 }
 0x41a   : > { %1715 = vlog2.f32 %v1217_v40 }
 0x41d   : > { %v1221_v44 = vpop.xlane.xlu0 %1220 }
 0x41e   : > { %v1219_v41 = vpop.xlane.xlu1 %1218 }
 0x41f   : > { %1717 = vlog2.f32 %v1219_v41 }
 0x420   : > { %1719 = vlog2.f32 %v1221_v44 }
 0x422   : > { %v1223_v45 = vpop.xlane.xlu1 %1222  ;;  %v1225_v46 = vpop.xlane.xlu0 %1224 }
 0x423   : > { %1721 = vlog2.f32 %v1223_v45 }
 0x424   : > { %1723 = vlog2.f32 %v1225_v46  ;;  %v1716_v47 = vpop.eup %1715 }
 0x425   : > { %v1249_v50 = vmul.f32 0.6931472, %v1716_v47 }
 0x426   : > { %v1227_v51 = vpop.xlane.xlu1 %1226  ;;  %v1229_v52 = vpop.xlane.xlu0 %1228 }
 0x427   : > { %1725 = vlog2.f32 %v1227_v51  ;;  %v1280_v53 = vsub.f32 %v1983_v42, %v1249_v50 }
 0x428   : > { %1727 = vlog2.f32 %v1229_v52 }
 0x429   : > { %v1718_v56 = vpop.eup %1717  ;;  %1296 = vst [vmem:[%s2116_s6] sm:$0xff] %v1280_v53 }
 0x42a   : > { %v1720_v57 = vpop.eup %1719  ;;  %v1251_v58 = vmul.f32 0.6931472, %v1718_v56  ;;  %v1231_v59 = vpop.xlane.xlu1 %1230 }
 0x42b   : > { %v1233_v62 = vpop.xlane.xlu0 %1232  ;;  %v1253_v63 = vmul.f32 0.6931472, %v1720_v57  ;;  %1729 = vlog2.f32 %v1231_v59 }
 0x42c   : > { %v1281_v0 = vsub.f32 %v1989_v48, %v1251_v58  ;;  %1731 = vlog2.f32 %v1233_v62 }
 0x42d   : > { %v1722_v1 = vpop.eup %1721  ;;  %v1282_v2 = vsub.f32 %v1985_v43, %v1253_v63 }
 0x42e   : > { %v1724_v3 = vpop.eup %1723  ;;  %1297 = vst [vmem:[%s2116_s6 + $0x8] sm:$0xff] %v1281_v0  ;;  %v1255_v42 = vmul.f32 0.6931472, %v1722_v1  ;;  %v1235_v6 = vpop.xlane.xlu1 %1234 }
 0x42f   : > { %v1237_v7 = vpop.xlane.xlu0 %1236  ;;  %1298 = vst [vmem:[%s2116_s6 + $0x10] sm:$0xff] %v1282_v2  ;;  %v1257_v8 = vmul.f32 0.6931472, %v1724_v3  ;;  %1733 = vlog2.f32 %v1235_v6 }
 0x430   : > { %v1283_v48 = vsub.f32 %v1991_v49, %v1255_v42  ;;  %1735 = vlog2.f32 %v1237_v7 }
 0x431   : > { %v1726_v9 = vpop.eup %1725  ;;  %v1284_v43 = vsub.f32 %v1995_v54, %v1257_v8 }
 0x432   : > { %v1728_v10 = vpop.eup %1727  ;;  %1299 = vst [vmem:[%s2116_s6 + $0x18] sm:$0xff] %v1283_v48  ;;  %v1259_v11 = vmul.f32 0.6931472, %v1726_v9  ;;  %v1239_v14 = vpop.xlane.xlu1 %1238 }
 0x433   : > { %v1241_v15 = vpop.xlane.xlu0 %1240  ;;  %1300 = vst [vmem:[%s2116_s6 + $0x20] sm:$0xff] %v1284_v43  ;;  %v1261_v16 = vmul.f32 0.6931472, %v1728_v10  ;;  %1737 = vlog2.f32 %v1239_v14 }
 0x434   : > { %v1285_v49 = vsub.f32 %v1997_v55, %v1259_v11  ;;  %1739 = vlog2.f32 %v1241_v15 }
 0x435   : > { %v1730_v17 = vpop.eup %1729  ;;  %v1286_v54 = vsub.f32 %v2001_v60, %v1261_v16 }
 0x436   : > { %v1732_v18 = vpop.eup %1731  ;;  %1301 = vst [vmem:[%s2116_s6 + $0x28] sm:$0xff] %v1285_v49  ;;  %v1263_v19 = vmul.f32 0.6931472, %v1730_v17  ;;  %v1243_v22 = vpop.xlane.xlu1 %1242 }
 0x437   : > { %v1245_v23 = vpop.xlane.xlu0 %1244  ;;  %1302 = vst [vmem:[%s2116_s6 + $0x30] sm:$0xff] %v1286_v54  ;;  %v1265_v24 = vmul.f32 0.6931472, %v1732_v18  ;;  %1741 = vlog2.f32 %v1243_v22 }
 0x438   : > { %v1287_v55 = vsub.f32 %v2003_v61, %v1263_v19  ;;  %1743 = vlog2.f32 %v1245_v23 }
 0x439   : > { %v1734_v25 = vpop.eup %1733  ;;  %v1288_v60 = vsub.f32 %v2007_v4, %v1265_v24 }
 0x43a   : > { %v1736_v26 = vpop.eup %1735  ;;  %1303 = vst [vmem:[%s2116_s6 + $0x38] sm:$0xff] %v1287_v55  ;;  %v1267_v27 = vmul.f32 0.6931472, %v1734_v25  ;;  %v1247_v30 = vpop.xlane.xlu1 %1246 }
 0x43b   : > { %1304 = vst [vmem:[%s2116_s6 + $0x40] sm:$0xff] %v1288_v60  ;;  %v1269_v31 = vmul.f32 0.6931472, %v1736_v26  ;;  %1745 = vlog2.f32 %v1247_v30 }
 0x43c   : > { %v1289_v32 = vsub.f32 %v2009_v5, %v1267_v27 }
 0x43d   : > { %v1738_v61 = vpop.eup %1737  ;;  %v1290_v33 = vsub.f32 %v2014_v12, %v1269_v31 }
 0x43e   : > { %v1740_v34 = vpop.eup %1739  ;;  %1305 = vst [vmem:[%s2116_s6 + $0x48] sm:$0xff] %v1289_v32  ;;  %v1271_v4 = vmul.f32 0.6931472, %v1738_v61 }
 0x43f   : > { %1306 = vst [vmem:[%s2116_s6 + $0x50] sm:$0xff] %v1290_v33  ;;  %v1273_v35 = vmul.f32 0.6931472, %v1740_v34 }
 0x440   : > { %v1291_v36 = vsub.f32 %v2017_v13, %v1271_v4 }
 0x441   : > { %v1742_v37 = vpop.eup %1741  ;;  %v1292_v38 = vsub.f32 %v2022_v20, %v1273_v35 }
 0x442   : > { %v1744_v5 = vpop.eup %1743  ;;  %1307 = vst [vmem:[%s2116_s6 + $0x58] sm:$0xff] %v1291_v36  ;;  %v1275_v12 = vmul.f32 0.6931472, %v1742_v37 }
 0x443   : > { %1308 = vst [vmem:[%s2116_s6 + $0x60] sm:$0xff] %v1292_v38  ;;  %v1277_v39 = vmul.f32 0.6931472, %v1744_v5 }
 0x444   : > { %v1293_v40 = vsub.f32 %v2025_v21, %v1275_v12 }
 0x445   : > { %v1746_v41 = vpop.eup %1745  ;;  %v1294_v44 = vsub.f32 %v2030_v28, %v1277_v39 }
 0x446   : > { %1309 = vst [vmem:[%s2116_s6 + $0x68] sm:$0xff] %v1293_v40  ;;  %v1279_v13 = vmul.f32 0.6931472, %v1746_v41 }
 0x447   : > { %1310 = vst [vmem:[%s2116_s6 + $0x70] sm:$0xff] %v1294_v44 }
 0x448   : > { %v1295_v20 = vsub.f32 %v2033_v29, %v1279_v13 }
 0x44a   : > { %1311 = vst [vmem:[%s2116_s6 + $0x78] sm:$0xff] %v1295_v20 }
 0x44b PF: > { %s16_s23 = sadd.s32 1, %s1769_s23   ;;  %s2117_s21 = smov %s1765_s22 }
 0x44c   : > { %p13_p7 = scmp.ge.s32.totalorder %s16_s23, 5   ;;  %s2118_s22 = smov %s2120_s24 }
 0x44e   :  { %15 = sbr.rel (!%p13_p7) target bundleno = 2 (0x2), region = 89 }

</bundles_post_ra>
